<compile_context>
chip_gen: v7x
topology: tpu7x:2x2x1
jax: 0.10.0
libtpu: 0.0.40
codegen_flags: <defaults>
</compile_context>

<pallas_src>
import functools

import jax
import jax.numpy as jnp
from jax import lax
from jax.experimental import pallas as pl
from jax.experimental.pallas import tpu as pltpu


_NEG_INF = -1e30  # large finite "masked" value: no NaN risk for masked rows


def block_kernel(x_ref,
                 ln1_g_ref, ln1_b_ref,
                 wqkv_ref, bqkv_ref,
                 wo_ref, bo_ref,
                 ln2_g_ref, ln2_b_ref,
                 w1_ref, b1_ref,
                 w2_ref, b2_ref,
                 out_ref,
                 *, num_heads):
    """One grid step = one batch element: a full (T, C) slice."""
    x = x_ref[0].astype(jnp.float32)            # (T, C) residual stream, f32
    T, C = x.shape
    H = num_heads
    hd = C // H
    eps = 1e-5                                  # PyTorch nn.LayerNorm default
    mm_dtype = wqkv_ref.dtype                   # bf16 in the fast path

    def layer_norm(v, g, b):
        mu = jnp.mean(v, axis=-1, keepdims=True)
        var = jnp.mean(jnp.square(v - mu), axis=-1, keepdims=True)  # biased var
        return (v - mu) * lax.rsqrt(var + eps) * g + b

    # ---------------- Multi-head causal self-attention (pre-LN) -------------
    xn = layer_norm(x, ln1_g_ref[0], ln1_b_ref[0])
    qkv = jnp.dot(xn.astype(mm_dtype), wqkv_ref[...],
                  preferred_element_type=jnp.float32) + bqkv_ref[0]  # (T, 3C)

    # Fold 1/sqrt(hd) into q: one (T, C) multiply instead of H * (T, T).
    scale = float(hd) ** -0.5
    q = qkv[:, :C] * scale
    k = qkv[:, C:2 * C]
    v = qkv[:, 2 * C:]

    # Head-major (H, T, hd) operands: both attention matmuls become a single
    # batched dot_general (batch dim = heads) instead of H tiny MXU dots +
    # a per-head concatenate.
    def to_heads(m):
        return jnp.stack([m[:, h * hd:(h + 1) * hd] for h in range(H)],
                         axis=0).astype(mm_dtype)

    q_h = to_heads(q)                           # (H, T, hd)
    k_h = to_heads(k)
    v_h = to_heads(v)

    s = jnp.einsum('hqd,hkd->hqk', q_h, k_h,
                   preferred_element_type=jnp.float32)          # (H, T, T) f32

    rows = lax.broadcasted_iota(jnp.int32, (1, T, T), 1)
    cols = lax.broadcasted_iota(jnp.int32, (1, T, T), 2)
    s = jnp.where(cols <= rows, s, _NEG_INF)    # causal (tril) mask

    s = s - jnp.max(s, axis=-1, keepdims=True)
    p = jnp.exp(s)
    denom = jnp.sum(p, axis=-1, keepdims=True)
    p = p * pl.reciprocal(denom, approx=True)   # EUP reciprocal (frees VALU)

    y_h = jnp.einsum('hqk,hkd->hqd', p.astype(mm_dtype), v_h,
                     preferred_element_type=jnp.float32)        # (H, T, hd)

    # Back to lane-dense (T, C): head h occupies lanes [h*hd, (h+1)*hd).
    y = jnp.concatenate([y_h[h] for h in range(H)], axis=-1)    # (T, C)

    y = jnp.dot(y.astype(mm_dtype), wo_ref[...],
                preferred_element_type=jnp.float32) + bo_ref[0]
    # attention / projection dropout -> identity (eval mode)
    x = x + y                                                   # residual 1

    # ---------------------------- Feed-forward ------------------------------
    # Note: full (T, 4C) hidden is materialized; with SEQ_LEN=256 this is only
    # a few MiB.  Chunk over the hidden dim for much longer sequences / larger C.
    xn2 = layer_norm(x, ln2_g_ref[0], ln2_b_ref[0])
    h1 = jnp.dot(xn2.astype(mm_dtype), w1_ref[...],
                 preferred_element_type=jnp.float32) + b1_ref[0]
    h1 = jnp.maximum(h1, 0.0)                                   # ReLU
    h2 = jnp.dot(h1.astype(mm_dtype), w2_ref[...],
                 preferred_element_type=jnp.float32) + b2_ref[0]
    # Dropout -> identity (eval mode).
    out_ref[0] = (x + h2).astype(out_ref.dtype)                 # residual 2


def transformer_block(x, params, *, num_heads, matmul_dtype=jnp.bfloat16):
    B, T, C = x.shape

    def full_spec(arr):
        shp = arr.shape
        return pl.BlockSpec(shp, lambda b, _n=len(shp): (0,) * _n)

    cast = lambda w: w.astype(matmul_dtype)
    # Weights cast to the matmul dtype on the host (halves weight DMA bytes);
    # biases / LN params stay f32 (added after f32 accumulation).
    param_list = [
        params["ln1_g"], params["ln1_b"],
        cast(params["wqkv"]), params["bqkv"],
        cast(params["wo"]), params["bo"],
        params["ln2_g"], params["ln2_b"],
        cast(params["w1"]), params["b1"],
        cast(params["w2"]), params["b2"],
    ]

    in_specs = [pl.BlockSpec((1, T, C), lambda b: (b, 0, 0))]
    in_specs += [full_spec(p) for p in param_list]

    return pl.pallas_call(
        functools.partial(block_kernel, num_heads=num_heads),
        out_shape=jax.ShapeDtypeStruct((B, T, C), x.dtype),
        grid=(B,),
        in_specs=in_specs,
        out_specs=pl.BlockSpec((1, T, C), lambda b: (b, 0, 0)),
        compiler_params=pltpu.CompilerParams(
            dimension_semantics=("parallel",),      # batch iters independent
            vmem_limit_bytes=64 * 1024 * 1024),
    )(x, *param_list)


def reference_block(x, params, *, num_heads):
    """Pure-JAX f32 reference mirroring the PyTorch forward (dropout = identity)."""
    B, T, C = x.shape
    hd = C // num_heads
    eps = 1e-5

    def ln(v, g, b):
        mu = jnp.mean(v, axis=-1, keepdims=True)
        var = jnp.mean((v - mu) ** 2, axis=-1, keepdims=True)
        return (v - mu) / jnp.sqrt(var + eps) * g + b

    xn = ln(x, params["ln1_g"][0], params["ln1_b"][0])
    qkv = xn @ params["wqkv"] + params["bqkv"][0]
    q, k, v = jnp.split(qkv, 3, axis=-1)
    q = q.reshape(B, T, num_heads, hd).transpose(0, 2, 1, 3)
    k = k.reshape(B, T, num_heads, hd).transpose(0, 2, 1, 3)
    v = v.reshape(B, T, num_heads, hd).transpose(0, 2, 1, 3)
    s = (q @ jnp.swapaxes(k, -2, -1)) * (hd ** -0.5)
    mask = jnp.tril(jnp.ones((T, T), dtype=bool))
    s = jnp.where(mask[None, None], s, -jnp.inf)
    w = jax.nn.softmax(s, axis=-1)
    y = (w @ v).transpose(0, 2, 1, 3).reshape(B, T, C)
    y = y @ params["wo"] + params["bo"][0]
    x = x + y
    xn2 = ln(x, params["ln2_g"][0], params["ln2_b"][0])
    h1 = jnp.maximum(xn2 @ params["w1"] + params["b1"][0], 0.0)
    h2 = h1 @ params["w2"] + params["b2"][0]
    return x + h2


def init_params(key, embed_dim):
    C = embed_dim
    F = 4 * C  # FEED_FORWARD_MULTIPLIER
    ks = jax.random.split(key, 8)
    scale = 0.02
    return {
        "ln1_g": jnp.ones((1, C), jnp.float32),
        "ln1_b": jnp.zeros((1, C), jnp.float32),
        "wqkv": scale * jax.random.normal(ks[0], (C, 3 * C), jnp.float32),
        "bqkv": scale * jax.random.normal(ks[1], (1, 3 * C), jnp.float32),
        "wo": scale * jax.random.normal(ks[2], (C, C), jnp.float32),
        "bo": scale * jax.random.normal(ks[3], (1, C), jnp.float32),
        "ln2_g": jnp.ones((1, C), jnp.float32),
        "ln2_b": jnp.zeros((1, C), jnp.float32),
        "w1": scale * jax.random.normal(ks[4], (C, F), jnp.float32),
        "b1": scale * jax.random.normal(ks[5], (1, F), jnp.float32),
        "w2": scale * jax.random.normal(ks[6], (F, C), jnp.float32),
        "b2": scale * jax.random.normal(ks[7], (1, C), jnp.float32),
    }


if __name__ == "__main__":
    # Small but layout-friendly shapes: C multiple of 128 (lane-dense stores),
    # T multiple of 8 (sublane-aligned), consistent with the module (T <= 256).
    B, T, C, H = 2, 16, 128, 4
    key = jax.random.PRNGKey(0)
    kx, kp = jax.random.split(key)
    x = jax.random.normal(kx, (B, T, C), jnp.float32)
    params = init_params(kp, C)

    ref = reference_block(x, params, num_heads=H)

    # Fast path: bf16 MXU operands, f32 accumulation + f32 vector math.
    out_bf16 = jax.block_until_ready(transformer_block(x, params, num_heads=H))
    err_bf16 = jnp.max(jnp.abs(out_bf16 - ref))
    assert jnp.allclose(out_bf16, ref, atol=3e-2, rtol=3e-2), (
        f"bf16 path max abs err {err_bf16}")

    # f32-operand path: tighter check of the kernel math itself.
    out_f32 = jax.block_until_ready(
        transformer_block(x, params, num_heads=H, matmul_dtype=jnp.float32))
    err_f32 = jnp.max(jnp.abs(out_f32 - ref))
    assert jnp.allclose(out_f32, ref, atol=2e-3, rtol=2e-3), (
        f"f32 path max abs err {err_f32}")

    print("KERNEL_OK")
</pallas_src>

<mosaic_0001>
module attributes {stable_mosaic.version = 11 : i64} {
  func.func @block_kernel(%arg0: i32, %arg1: memref<1x16x128xf32, #tpu.memory_space<vmem>>, %arg2: memref<1x128xf32, #tpu.memory_space<vmem>>, %arg3: memref<1x128xf32, #tpu.memory_space<vmem>>, %arg4: memref<128x384xbf16, #tpu.memory_space<vmem>>, %arg5: memref<1x384xf32, #tpu.memory_space<vmem>>, %arg6: memref<128x128xbf16, #tpu.memory_space<vmem>>, %arg7: memref<1x128xf32, #tpu.memory_space<vmem>>, %arg8: memref<1x128xf32, #tpu.memory_space<vmem>>, %arg9: memref<1x128xf32, #tpu.memory_space<vmem>>, %arg10: memref<128x512xbf16, #tpu.memory_space<vmem>>, %arg11: memref<1x512xf32, #tpu.memory_space<vmem>>, %arg12: memref<512x128xbf16, #tpu.memory_space<vmem>>, %arg13: memref<1x128xf32, #tpu.memory_space<vmem>>, %arg14: memref<1x16x128xf32, #tpu.memory_space<vmem>>) attributes {dimension_semantics = [#tpu.dimension_semantics<parallel>], iteration_bounds = array<i64: 2>, scalar_prefetch = 0 : i64, scratch_operands = 0 : i64, tpu.core_type = #tpu.core_type<tc>, window_params = [{transform_indices = @transform_0, window_bounds = array<i64: 1, 16, 128>}, {pipeline_mode = #tpu.pipeline_mode<synchronous>, transform_indices = @transform_1, window_bounds = array<i64: 1, 128>}, {pipeline_mode = #tpu.pipeline_mode<synchronous>, transform_indices = @transform_2, window_bounds = array<i64: 1, 128>}, {pipeline_mode = #tpu.pipeline_mode<synchronous>, transform_indices = @transform_3, window_bounds = array<i64: 128, 384>}, {pipeline_mode = #tpu.pipeline_mode<synchronous>, transform_indices = @transform_4, window_bounds = array<i64: 1, 384>}, {pipeline_mode = #tpu.pipeline_mode<synchronous>, transform_indices = @transform_5, window_bounds = array<i64: 128, 128>}, {pipeline_mode = #tpu.pipeline_mode<synchronous>, transform_indices = @transform_6, window_bounds = array<i64: 1, 128>}, {pipeline_mode = #tpu.pipeline_mode<synchronous>, transform_indices = @transform_7, window_bounds = array<i64: 1, 128>}, {pipeline_mode = #tpu.pipeline_mode<synchronous>, transform_indices = @transform_8, window_bounds = array<i64: 1, 128>}, {pipeline_mode = #tpu.pipeline_mode<synchronous>, transform_indices = @transform_9, window_bounds = array<i64: 128, 512>}, {pipeline_mode = #tpu.pipeline_mode<synchronous>, transform_indices = @transform_10, window_bounds = array<i64: 1, 512>}, {pipeline_mode = #tpu.pipeline_mode<synchronous>, transform_indices = @transform_11, window_bounds = array<i64: 512, 128>}, {pipeline_mode = #tpu.pipeline_mode<synchronous>, transform_indices = @transform_12, window_bounds = array<i64: 1, 128>}, {transform_indices = @transform_13, window_bounds = array<i64: 1, 16, 128>}]} {
    %c0 = arith.constant 0 : index
    %c0_0 = arith.constant 0 : index
    %c0_1 = arith.constant 0 : index
    %0 = vector.load %arg1[%c0, %c0_0, %c0_1] : memref<1x16x128xf32, #tpu.memory_space<vmem>>, vector<1x16x128xf32>
    %1 = vector.shape_cast %0 : vector<1x16x128xf32> to vector<16x128xf32>
    %c0_2 = arith.constant 0 : index
    %c0_3 = arith.constant 0 : index
    %2 = vector.load %arg2[%c0_2, %c0_3] : memref<1x128xf32, #tpu.memory_space<vmem>>, vector<1x128xf32>
    %3 = vector.shape_cast %2 : vector<1x128xf32> to vector<128xf32>
    %c0_4 = arith.constant 0 : index
    %c0_5 = arith.constant 0 : index
    %4 = vector.load %arg3[%c0_4, %c0_5] : memref<1x128xf32, #tpu.memory_space<vmem>>, vector<1x128xf32>
    %5 = vector.shape_cast %4 : vector<1x128xf32> to vector<128xf32>
    %cst = arith.constant dense<0.000000e+00> : vector<16xf32>
    %6 = vector.multi_reduction <add>, %1, %cst [1] : vector<16x128xf32> to vector<16xf32>
    %7 = vector.shape_cast %6 : vector<16xf32> to vector<16x1xf32>
    %cst_6 = arith.constant 1.280000e+02 : f32
    %8 = vector.broadcast %cst_6 : f32 to vector<16x1xf32>
    %9 = arith.divf %7, %8 : vector<16x1xf32>
    %10 = vector.broadcast %9 : vector<16x1xf32> to vector<16x128xf32>
    %11 = arith.subf %1, %10 : vector<16x128xf32>
    %12 = arith.mulf %11, %11 : vector<16x128xf32>
    %cst_7 = arith.constant dense<0.000000e+00> : vector<16xf32>
    %13 = vector.multi_reduction <add>, %12, %cst_7 [1] : vector<16x128xf32> to vector<16xf32>
    %14 = vector.shape_cast %13 : vector<16xf32> to vector<16x1xf32>
    %cst_8 = arith.constant 1.280000e+02 : f32
    %15 = vector.broadcast %cst_8 : f32 to vector<16x1xf32>
    %16 = arith.divf %14, %15 : vector<16x1xf32>
    %17 = vector.broadcast %9 : vector<16x1xf32> to vector<16x128xf32>
    %18 = arith.subf %1, %17 : vector<16x128xf32>
    %cst_9 = arith.constant 9.99999974E-6 : f32
    %19 = vector.broadcast %cst_9 : f32 to vector<16x1xf32>
    %20 = arith.addf %16, %19 : vector<16x1xf32>
    %21 = math.rsqrt %20 : vector<16x1xf32>
    %22 = vector.broadcast %21 : vector<16x1xf32> to vector<16x128xf32>
    %23 = arith.mulf %18, %22 : vector<16x128xf32>
    %24 = vector.shape_cast %3 : vector<128xf32> to vector<1x128xf32>
    %25 = vector.broadcast %24 : vector<1x128xf32> to vector<16x128xf32>
    %26 = arith.mulf %23, %25 : vector<16x128xf32>
    %27 = vector.shape_cast %5 : vector<128xf32> to vector<1x128xf32>
    %28 = vector.broadcast %27 : vector<1x128xf32> to vector<16x128xf32>
    %29 = arith.addf %26, %28 : vector<16x128xf32>
    %30 = arith.truncf %29 : vector<16x128xf32> to vector<16x128xbf16>
    %c0_10 = arith.constant 0 : index
    %c0_11 = arith.constant 0 : index
    %31 = vector.load %arg4[%c0_10, %c0_11] : memref<128x384xbf16, #tpu.memory_space<vmem>>, vector<128x384xbf16>
    %cst_12 = arith.constant dense<0.000000e+00> : vector<16x384xf32>
    %32 = tpu.matmul %30, %31, %cst_12 {dimension_numbers = #tpu.dot_dimension_numbers<[1], [0], [0], [1], [0, 0, 1, 1], [], []>} : vector<16x128xbf16>, vector<128x384xbf16>, vector<16x384xf32> -> vector<16x384xf32>
    %c0_13 = arith.constant 0 : index
    %c0_14 = arith.constant 0 : index
    %33 = vector.load %arg5[%c0_13, %c0_14] : memref<1x384xf32, #tpu.memory_space<vmem>>, vector<1x384xf32>
    %34 = vector.shape_cast %33 : vector<1x384xf32> to vector<384xf32>
    %35 = vector.shape_cast %34 : vector<384xf32> to vector<1x384xf32>
    %36 = vector.broadcast %35 : vector<1x384xf32> to vector<16x384xf32>
    %37 = arith.addf %32, %36 : vector<16x384xf32>
    %38 = vector.extract_strided_slice %37 {offsets = [0, 0], sizes = [16, 128], strides = [1, 1]} : vector<16x384xf32> to vector<16x128xf32>
    %cst_15 = arith.constant 0.176776692 : f32
    %39 = vector.broadcast %cst_15 : f32 to vector<16x128xf32>
    %40 = arith.mulf %38, %39 : vector<16x128xf32>
    %41 = vector.extract_strided_slice %37 {offsets = [0, 128], sizes = [16, 128], strides = [1, 1]} : vector<16x384xf32> to vector<16x128xf32>
    %42 = vector.extract_strided_slice %37 {offsets = [0, 256], sizes = [16, 128], strides = [1, 1]} : vector<16x384xf32> to vector<16x128xf32>
    %43 = vector.extract_strided_slice %40 {offsets = [0, 0], sizes = [16, 32], strides = [1, 1]} : vector<16x128xf32> to vector<16x32xf32>
    %44 = vector.extract_strided_slice %40 {offsets = [0, 32], sizes = [16, 32], strides = [1, 1]} : vector<16x128xf32> to vector<16x32xf32>
    %45 = vector.extract_strided_slice %40 {offsets = [0, 64], sizes = [16, 32], strides = [1, 1]} : vector<16x128xf32> to vector<16x32xf32>
    %46 = vector.extract_strided_slice %40 {offsets = [0, 96], sizes = [16, 32], strides = [1, 1]} : vector<16x128xf32> to vector<16x32xf32>
    %47 = vector.shape_cast %43 : vector<16x32xf32> to vector<1x16x32xf32>
    %48 = vector.shape_cast %44 : vector<16x32xf32> to vector<1x16x32xf32>
    %49 = vector.shape_cast %45 : vector<16x32xf32> to vector<1x16x32xf32>
    %50 = vector.shape_cast %46 : vector<16x32xf32> to vector<1x16x32xf32>
    %51 = tpu.concatenate %47, %48, %49, %50 in 0 : vector<1x16x32xf32>, vector<1x16x32xf32>, vector<1x16x32xf32>, vector<1x16x32xf32> -> vector<4x16x32xf32>
    %52 = arith.truncf %51 : vector<4x16x32xf32> to vector<4x16x32xbf16>
    %53 = vector.extract_strided_slice %41 {offsets = [0, 0], sizes = [16, 32], strides = [1, 1]} : vector<16x128xf32> to vector<16x32xf32>
    %54 = vector.extract_strided_slice %41 {offsets = [0, 32], sizes = [16, 32], strides = [1, 1]} : vector<16x128xf32> to vector<16x32xf32>
    %55 = vector.extract_strided_slice %41 {offsets = [0, 64], sizes = [16, 32], strides = [1, 1]} : vector<16x128xf32> to vector<16x32xf32>
    %56 = vector.extract_strided_slice %41 {offsets = [0, 96], sizes = [16, 32], strides = [1, 1]} : vector<16x128xf32> to vector<16x32xf32>
    %57 = vector.shape_cast %53 : vector<16x32xf32> to vector<1x16x32xf32>
    %58 = vector.shape_cast %54 : vector<16x32xf32> to vector<1x16x32xf32>
    %59 = vector.shape_cast %55 : vector<16x32xf32> to vector<1x16x32xf32>
    %60 = vector.shape_cast %56 : vector<16x32xf32> to vector<1x16x32xf32>
    %61 = tpu.concatenate %57, %58, %59, %60 in 0 : vector<1x16x32xf32>, vector<1x16x32xf32>, vector<1x16x32xf32>, vector<1x16x32xf32> -> vector<4x16x32xf32>
    %62 = arith.truncf %61 : vector<4x16x32xf32> to vector<4x16x32xbf16>
    %63 = vector.extract_strided_slice %42 {offsets = [0, 0], sizes = [16, 32], strides = [1, 1]} : vector<16x128xf32> to vector<16x32xf32>
    %64 = vector.extract_strided_slice %42 {offsets = [0, 32], sizes = [16, 32], strides = [1, 1]} : vector<16x128xf32> to vector<16x32xf32>
    %65 = vector.extract_strided_slice %42 {offsets = [0, 64], sizes = [16, 32], strides = [1, 1]} : vector<16x128xf32> to vector<16x32xf32>
    %66 = vector.extract_strided_slice %42 {offsets = [0, 96], sizes = [16, 32], strides = [1, 1]} : vector<16x128xf32> to vector<16x32xf32>
    %67 = vector.shape_cast %63 : vector<16x32xf32> to vector<1x16x32xf32>
    %68 = vector.shape_cast %64 : vector<16x32xf32> to vector<1x16x32xf32>
    %69 = vector.shape_cast %65 : vector<16x32xf32> to vector<1x16x32xf32>
    %70 = vector.shape_cast %66 : vector<16x32xf32> to vector<1x16x32xf32>
    %71 = tpu.concatenate %67, %68, %69, %70 in 0 : vector<1x16x32xf32>, vector<1x16x32xf32>, vector<1x16x32xf32>, vector<1x16x32xf32> -> vector<4x16x32xf32>
    %72 = arith.truncf %71 : vector<4x16x32xf32> to vector<4x16x32xbf16>
    "tpu.trace_start"() <{level = 10 : i32, message = "hqd,hkd->hqk"}> : () -> ()
    %cst_16 = arith.constant dense<0.000000e+00> : vector<4x16x16xf32>
    %73 = tpu.matmul %52, %62, %cst_16 {dimension_numbers = #tpu.dot_dimension_numbers<[2], [2], [1], [1], [0, 0, 0, 1, 1, 1], [0], [0]>} : vector<4x16x32xbf16>, vector<4x16x32xbf16>, vector<4x16x16xf32> -> vector<4x16x16xf32>
    "tpu.trace_stop"() : () -> ()
    %74 = tpu.iota {dimensions = array<i32: 1>} : vector<1x16x16xi32>
    %75 = tpu.iota {dimensions = array<i32: 2>} : vector<1x16x16xi32>
    %76 = arith.cmpi sle, %75, %74 : vector<1x16x16xi32>
    %cst_17 = arith.constant -1.000000e+30 : f32
    %77 = vector.shape_cast %76 : vector<1x16x16xi1> to vector<1x16x16xi1>
    %78 = vector.broadcast %77 : vector<1x16x16xi1> to vector<4x16x16xi1>
    %79 = vector.broadcast %cst_17 : f32 to vector<4x16x16xf32>
    %80 = arith.select %78, %73, %79 : vector<4x16x16xi1>, vector<4x16x16xf32>
    %cst_18 = arith.constant dense<0xFF800000> : vector<4x16xf32>
    %81 = vector.multi_reduction <maximumf>, %80, %cst_18 [2] : vector<4x16x16xf32> to vector<4x16xf32>
    %82 = vector.shape_cast %81 : vector<4x16xf32> to vector<4x16x1xf32>
    %83 = vector.broadcast %82 : vector<4x16x1xf32> to vector<4x16x16xf32>
    %84 = arith.subf %80, %83 : vector<4x16x16xf32>
    %85 = math.exp %84 : vector<4x16x16xf32>
    %cst_19 = arith.constant dense<0.000000e+00> : vector<4x16xf32>
    %86 = vector.multi_reduction <add>, %85, %cst_19 [2] : vector<4x16x16xf32> to vector<4x16xf32>
    %87 = vector.shape_cast %86 : vector<4x16xf32> to vector<4x16x1xf32>
    %88 = tpu.reciprocal %87 {approx = true} : vector<4x16x1xf32> -> vector<4x16x1xf32>
    %89 = vector.broadcast %88 : vector<4x16x1xf32> to vector<4x16x16xf32>
    %90 = arith.mulf %85, %89 : vector<4x16x16xf32>
    %91 = arith.truncf %90 : vector<4x16x16xf32> to vector<4x16x16xbf16>
    "tpu.trace_start"() <{level = 10 : i32, message = "hqk,hkd->hqd"}> : () -> ()
    %cst_20 = arith.constant dense<0.000000e+00> : vector<4x16x32xf32>
    %92 = tpu.matmul %91, %72, %cst_20 {dimension_numbers = #tpu.dot_dimension_numbers<[2], [1], [1], [2], [0, 0, 0, 1, 1, 2], [0], [0]>} : vector<4x16x16xbf16>, vector<4x16x32xbf16>, vector<4x16x32xf32> -> vector<4x16x32xf32>
    "tpu.trace_stop"() : () -> ()
    %93 = vector.extract_strided_slice %92 {offsets = [0, 0, 0], sizes = [1, 16, 32], strides = [1, 1, 1]} : vector<4x16x32xf32> to vector<1x16x32xf32>
    %94 = vector.shape_cast %93 : vector<1x16x32xf32> to vector<16x32xf32>
    %95 = vector.extract_strided_slice %92 {offsets = [1, 0, 0], sizes = [1, 16, 32], strides = [1, 1, 1]} : vector<4x16x32xf32> to vector<1x16x32xf32>
    %96 = vector.shape_cast %95 : vector<1x16x32xf32> to vector<16x32xf32>
    %97 = vector.extract_strided_slice %92 {offsets = [2, 0, 0], sizes = [1, 16, 32], strides = [1, 1, 1]} : vector<4x16x32xf32> to vector<1x16x32xf32>
    %98 = vector.shape_cast %97 : vector<1x16x32xf32> to vector<16x32xf32>
    %99 = vector.extract_strided_slice %92 {offsets = [3, 0, 0], sizes = [1, 16, 32], strides = [1, 1, 1]} : vector<4x16x32xf32> to vector<1x16x32xf32>
    %100 = vector.shape_cast %99 : vector<1x16x32xf32> to vector<16x32xf32>
    %101 = tpu.concatenate %94, %96, %98, %100 in 1 : vector<16x32xf32>, vector<16x32xf32>, vector<16x32xf32>, vector<16x32xf32> -> vector<16x128xf32>
    %102 = arith.truncf %101 : vector<16x128xf32> to vector<16x128xbf16>
    %c0_21 = arith.constant 0 : index
    %c0_22 = arith.constant 0 : index
    %103 = vector.load %arg6[%c0_21, %c0_22] : memref<128x128xbf16, #tpu.memory_space<vmem>>, vector<128x128xbf16>
    %cst_23 = arith.constant dense<0.000000e+00> : vector<16x128xf32>
    %104 = tpu.matmul %102, %103, %cst_23 {dimension_numbers = #tpu.dot_dimension_numbers<[1], [0], [0], [1], [0, 0, 1, 1], [], []>} : vector<16x128xbf16>, vector<128x128xbf16>, vector<16x128xf32> -> vector<16x128xf32>
    %c0_24 = arith.constant 0 : index
    %c0_25 = arith.constant 0 : index
    %105 = vector.load %arg7[%c0_24, %c0_25] : memref<1x128xf32, #tpu.memory_space<vmem>>, vector<1x128xf32>
    %106 = vector.shape_cast %105 : vector<1x128xf32> to vector<128xf32>
    %107 = vector.shape_cast %106 : vector<128xf32> to vector<1x128xf32>
    %108 = vector.broadcast %107 : vector<1x128xf32> to vector<16x128xf32>
    %109 = arith.addf %104, %108 : vector<16x128xf32>
    %110 = arith.addf %1, %109 : vector<16x128xf32>
    %c0_26 = arith.constant 0 : index
    %c0_27 = arith.constant 0 : index
    %111 = vector.load %arg8[%c0_26, %c0_27] : memref<1x128xf32, #tpu.memory_space<vmem>>, vector<1x128xf32>
    %112 = vector.shape_cast %111 : vector<1x128xf32> to vector<128xf32>
    %c0_28 = arith.constant 0 : index
    %c0_29 = arith.constant 0 : index
    %113 = vector.load %arg9[%c0_28, %c0_29] : memref<1x128xf32, #tpu.memory_space<vmem>>, vector<1x128xf32>
    %114 = vector.shape_cast %113 : vector<1x128xf32> to vector<128xf32>
    %cst_30 = arith.constant dense<0.000000e+00> : vector<16xf32>
    %115 = vector.multi_reduction <add>, %110, %cst_30 [1] : vector<16x128xf32> to vector<16xf32>
    %116 = vector.shape_cast %115 : vector<16xf32> to vector<16x1xf32>
    %cst_31 = arith.constant 1.280000e+02 : f32
    %117 = vector.broadcast %cst_31 : f32 to vector<16x1xf32>
    %118 = arith.divf %116, %117 : vector<16x1xf32>
    %119 = vector.broadcast %118 : vector<16x1xf32> to vector<16x128xf32>
    %120 = arith.subf %110, %119 : vector<16x128xf32>
    %121 = arith.mulf %120, %120 : vector<16x128xf32>
    %cst_32 = arith.constant dense<0.000000e+00> : vector<16xf32>
    %122 = vector.multi_reduction <add>, %121, %cst_32 [1] : vector<16x128xf32> to vector<16xf32>
    %123 = vector.shape_cast %122 : vector<16xf32> to vector<16x1xf32>
    %cst_33 = arith.constant 1.280000e+02 : f32
    %124 = vector.broadcast %cst_33 : f32 to vector<16x1xf32>
    %125 = arith.divf %123, %124 : vector<16x1xf32>
    %126 = vector.broadcast %118 : vector<16x1xf32> to vector<16x128xf32>
    %127 = arith.subf %110, %126 : vector<16x128xf32>
    %cst_34 = arith.constant 9.99999974E-6 : f32
    %128 = vector.broadcast %cst_34 : f32 to vector<16x1xf32>
    %129 = arith.addf %125, %128 : vector<16x1xf32>
    %130 = math.rsqrt %129 : vector<16x1xf32>
    %131 = vector.broadcast %130 : vector<16x1xf32> to vector<16x128xf32>
    %132 = arith.mulf %127, %131 : vector<16x128xf32>
    %133 = vector.shape_cast %112 : vector<128xf32> to vector<1x128xf32>
    %134 = vector.broadcast %133 : vector<1x128xf32> to vector<16x128xf32>
    %135 = arith.mulf %132, %134 : vector<16x128xf32>
    %136 = vector.shape_cast %114 : vector<128xf32> to vector<1x128xf32>
    %137 = vector.broadcast %136 : vector<1x128xf32> to vector<16x128xf32>
    %138 = arith.addf %135, %137 : vector<16x128xf32>
    %139 = arith.truncf %138 : vector<16x128xf32> to vector<16x128xbf16>
    %c0_35 = arith.constant 0 : index
    %c0_36 = arith.constant 0 : index
    %140 = vector.load %arg10[%c0_35, %c0_36] : memref<128x512xbf16, #tpu.memory_space<vmem>>, vector<128x512xbf16>
    %cst_37 = arith.constant dense<0.000000e+00> : vector<16x512xf32>
    %141 = tpu.matmul %139, %140, %cst_37 {dimension_numbers = #tpu.dot_dimension_numbers<[1], [0], [0], [1], [0, 0, 1, 1], [], []>} : vector<16x128xbf16>, vector<128x512xbf16>, vector<16x512xf32> -> vector<16x512xf32>
    %c0_38 = arith.constant 0 : index
    %c0_39 = arith.constant 0 : index
    %142 = vector.load %arg11[%c0_38, %c0_39] : memref<1x512xf32, #tpu.memory_space<vmem>>, vector<1x512xf32>
    %143 = vector.shape_cast %142 : vector<1x512xf32> to vector<512xf32>
    %144 = vector.shape_cast %143 : vector<512xf32> to vector<1x512xf32>
    %145 = vector.broadcast %144 : vector<1x512xf32> to vector<16x512xf32>
    %146 = arith.addf %141, %145 : vector<16x512xf32>
    %cst_40 = arith.constant 0.000000e+00 : f32
    %147 = vector.broadcast %cst_40 : f32 to vector<16x512xf32>
    %148 = arith.maximumf %146, %147 : vector<16x512xf32>
    %149 = arith.truncf %148 : vector<16x512xf32> to vector<16x512xbf16>
    %c0_41 = arith.constant 0 : index
    %c0_42 = arith.constant 0 : index
    %150 = vector.load %arg12[%c0_41, %c0_42] : memref<512x128xbf16, #tpu.memory_space<vmem>>, vector<512x128xbf16>
    %cst_43 = arith.constant dense<0.000000e+00> : vector<16x128xf32>
    %151 = tpu.matmul %149, %150, %cst_43 {dimension_numbers = #tpu.dot_dimension_numbers<[1], [0], [0], [1], [0, 0, 1, 1], [], []>} : vector<16x512xbf16>, vector<512x128xbf16>, vector<16x128xf32> -> vector<16x128xf32>
    %c0_44 = arith.constant 0 : index
    %c0_45 = arith.constant 0 : index
    %152 = vector.load %arg13[%c0_44, %c0_45] : memref<1x128xf32, #tpu.memory_space<vmem>>, vector<1x128xf32>
    %153 = vector.shape_cast %152 : vector<1x128xf32> to vector<128xf32>
    %154 = vector.shape_cast %153 : vector<128xf32> to vector<1x128xf32>
    %155 = vector.broadcast %154 : vector<1x128xf32> to vector<16x128xf32>
    %156 = arith.addf %151, %155 : vector<16x128xf32>
    %157 = arith.addf %110, %156 : vector<16x128xf32>
    %c0_46 = arith.constant 0 : index
    %c0_47 = arith.constant 0 : index
    %c0_48 = arith.constant 0 : index
    %158 = vector.load %arg14[%c0_46, %c0_47, %c0_48] : memref<1x16x128xf32, #tpu.memory_space<vmem>>, vector<1x16x128xf32>
    %159 = vector.shape_cast %158 : vector<1x16x128xf32> to vector<16x128xf32>
    %160 = vector.shape_cast %157 : vector<16x128xf32> to vector<1x16x128xf32>
    tpu.vector_store %arg14[%c0_46, %c0_47, %c0_48], %160 {strides = array<i32>} : memref<1x16x128xf32, #tpu.memory_space<vmem>>, vector<1x16x128xf32>,
    return
  }
  func.func @transform_0(%arg0: i32) -> (i32, i32, i32) {
    %c0_i32 = arith.constant 0 : i32
    %c0_i32_0 = arith.constant 0 : i32
    %c0_i32_1 = arith.constant 0 : i32
    return %arg0, %c0_i32, %c0_i32_0 : i32, i32, i32
  }
  func.func @transform_1(%arg0: i32) -> (i32, i32) {
    %c0_i32 = arith.constant 0 : i32
    %c0_i32_0 = arith.constant 0 : i32
    %c0_i32_1 = arith.constant 0 : i32
    return %c0_i32, %c0_i32_0 : i32, i32
  }
  func.func @transform_2(%arg0: i32) -> (i32, i32) {
    %c0_i32 = arith.constant 0 : i32
    %c0_i32_0 = arith.constant 0 : i32
    %c0_i32_1 = arith.constant 0 : i32
    return %c0_i32, %c0_i32_0 : i32, i32
  }
  func.func @transform_3(%arg0: i32) -> (i32, i32) {
    %c0_i32 = arith.constant 0 : i32
    %c0_i32_0 = arith.constant 0 : i32
    %c0_i32_1 = arith.constant 0 : i32
    return %c0_i32, %c0_i32_0 : i32, i32
  }
  func.func @transform_4(%arg0: i32) -> (i32, i32) {
    %c0_i32 = arith.constant 0 : i32
    %c0_i32_0 = arith.constant 0 : i32
    %c0_i32_1 = arith.constant 0 : i32
    return %c0_i32, %c0_i32_0 : i32, i32
  }
  func.func @transform_5(%arg0: i32) -> (i32, i32) {
    %c0_i32 = arith.constant 0 : i32
    %c0_i32_0 = arith.constant 0 : i32
    %c0_i32_1 = arith.constant 0 : i32
    return %c0_i32, %c0_i32_0 : i32, i32
  }
  func.func @transform_6(%arg0: i32) -> (i32, i32) {
    %c0_i32 = arith.constant 0 : i32
    %c0_i32_0 = arith.constant 0 : i32
    %c0_i32_1 = arith.constant 0 : i32
    return %c0_i32, %c0_i32_0 : i32, i32
  }
  func.func @transform_7(%arg0: i32) -> (i32, i32) {
    %c0_i32 = arith.constant 0 : i32
    %c0_i32_0 = arith.constant 0 : i32
    %c0_i32_1 = arith.constant 0 : i32
    return %c0_i32, %c0_i32_0 : i32, i32
  }
  func.func @transform_8(%arg0: i32) -> (i32, i32) {
    %c0_i32 = arith.constant 0 : i32
    %c0_i32_0 = arith.constant 0 : i32
    %c0_i32_1 = arith.constant 0 : i32
    return %c0_i32, %c0_i32_0 : i32, i32
  }
  func.func @transform_9(%arg0: i32) -> (i32, i32) {
    %c0_i32 = arith.constant 0 : i32
    %c0_i32_0 = arith.constant 0 : i32
    %c0_i32_1 = arith.constant 0 : i32
    return %c0_i32, %c0_i32_0 : i32, i32
  }
  func.func @transform_10(%arg0: i32) -> (i32, i32) {
    %c0_i32 = arith.constant 0 : i32
    %c0_i32_0 = arith.constant 0 : i32
    %c0_i32_1 = arith.constant 0 : i32
    return %c0_i32, %c0_i32_0 : i32, i32
  }
  func.func @transform_11(%arg0: i32) -> (i32, i32) {
    %c0_i32 = arith.constant 0 : i32
    %c0_i32_0 = arith.constant 0 : i32
    %c0_i32_1 = arith.constant 0 : i32
    return %c0_i32, %c0_i32_0 : i32, i32
  }
  func.func @transform_12(%arg0: i32) -> (i32, i32) {
    %c0_i32 = arith.constant 0 : i32
    %c0_i32_0 = arith.constant 0 : i32
    %c0_i32_1 = arith.constant 0 : i32
    return %c0_i32, %c0_i32_0 : i32, i32
  }
  func.func @transform_13(%arg0: i32) -> (i32, i32, i32) {
    %c0_i32 = arith.constant 0 : i32
    %c0_i32_0 = arith.constant 0 : i32
    %c0_i32_1 = arith.constant 0 : i32
    return %arg0, %c0_i32, %c0_i32_0 : i32, i32, i32
  }
}

</mosaic_0001>

<bundles_post_ra>
// kernel: tpu_custom_call.1
= control target key start
LH: loop header
LB: loop body
LE: loop exit
PB: predicated region body
PF: predicated region fallthrough
CT: control target
= control target key end

     0   :  { %s4435_s0 = inlined_call_operand.hbm [shape: f32[2,16,128], index: 0, kind: input, shape index: {}]   ;;  %s4436_s1 = inlined_call_operand.hbm [shape: f32[1,128], index: 1, kind: input, shape index: {}]   ;;  %s4437_s2 = inlined_call_operand.hbm [shape: f32[1,128], index: 2, kind: input, shape index: {}]   ;;  %s4438_s3 = inlined_call_operand.hbm [shape: bf16[128,384], index: 3, kind: input, shape index: {}]   ;;  %s4439_s4 = inlined_call_operand.hbm [shape: f32[1,384], index: 4, kind: input, shape index: {}]   ;;  %s4440_s5 = inlined_call_operand.hbm [shape: bf16[128,128], index: 5, kind: input, shape index: {}]   ;;  %s4441_s6 = inlined_call_operand.hbm [shape: f32[1,128], index: 6, kind: input, shape index: {}]   ;;  %s4442_s7 = inlined_call_operand.hbm [shape: f32[1,128], index: 7, kind: input, shape index: {}]   ;;  %s4443_s8 = inlined_call_operand.hbm [shape: f32[1,128], index: 8, kind: input, shape index: {}]   ;;  %s4444_s9 = inlined_call_operand.hbm [shape: bf16[128,512], index: 9, kind: input, shape index: {}]   ;;  %s4445_s10 = inlined_call_operand.hbm [shape: f32[1,512], index: 10, kind: input, shape index: {}]   ;;  %s4446_s11 = inlined_call_operand.hbm [shape: bf16[512,128], index: 11, kind: input, shape index: {}]   ;;  %s4447_s12 = inlined_call_operand.hbm [shape: f32[1,128], index: 12, kind: input, shape index: {}]   ;;  %s4448_s13 = inlined_call_operand.hbm [shape: f32[2,16,128], index: 13, kind: output, shape index: {}]  }
   0x1   :  { %4460 = sst [smem:[#allocation35_spill]] %s4435_s0 }
   0x2   :  { %4461 = sst [smem:[#allocation36_spill]] %s4436_s1 }
   0x3   :  { %4462 = sst [smem:[#allocation37_spill]] %s4438_s3 }
   0x4   :  { %4463 = sst [smem:[#allocation38_spill]] %s4448_s13 }
   0x5   :  { %18 = vsyncpa [#allocation3], 0 }
   0x6   :  { %20 = vsyncpa [#allocation3 + $0x1], 0 }
   0x7   :  { %21 = vsyncpa [#allocation6], 0 }
   0x8   :  { %22 = vsyncpa [#allocation9], 0 }
   0x9   :  { %23 = vsyncpa [#allocation12], 0 }
   0xa   :  { %24 = vsyncpa [#allocation15], 0 }
   0xb   :  { %25 = vsyncpa [#allocation18], 0 }
   0xc   :  { %26 = vsyncpa [#allocation21], 0 }
   0xd   :  { %27 = vsyncpa [#allocation4], 0 }
   0xe   :  { %29 = vsyncpa [#allocation4 + $0x1], 0  ;;  %s3803_s25 = smov 0   ;;  %s3805_s26 = smov 0  }
   0xf   :  { %s3807_s27 = smov 0   ;;  %s3809_s28 = smov 0  }
  0x10 LB: > { %4464 = sst [smem:[#allocation32_spill]] %s3689_s25  ;;  %s3703_s29 = smov [#allocation5]   ;;  %s3701_s28 = sphi %s3809_s28, %s4506_s28   ;;  %s3697_s27 = sphi %s3807_s27, %s4505_s27   ;;  %s3693_s26 = sphi %s3805_s26, %s4504_s26   ;;  %s3689_s25 = sphi %s3803_s25, %s4503_s25  }
  0x11   : > { %s357_s30 = sshll.u32 %s3703_s29, 4  ;;  %s3824_s14 = sadd.s32 4294967295, %s3701_s28   ;;  %s3829_s30 = int_to_ptr.vmem [resolvable:$true] %s357_s30 }
  0x12   : > { %4465 = sst [smem:[#allocation33_spill]] %s3824_s14  ;;  %p2525_p0 = scmp.ge.s32.totalorder %s3701_s28, 1 }
  0x13   : > { %p4455_p1 = scmp.eq.s32.totalorder %s3824_s14, 0  ;;  %p344_p2 = scmp.lt.s32.totalorder %s3701_s28, 3 }
  0x14   : > { %s3704_s16 = smov [#allocation8]   ;;  %s3705_s19 = smov [#allocation11]  }
  0x15   : > { %p3831_p3 = pnand %p2525_p0, %p344_p2  ;;  %s378_s17 = sshll.u32 %s3704_s16, 4  ;;  %s3838_s17 = int_to_ptr.vmem [resolvable:$true] %s378_s17 }
  0x16   : > { %s402_s20 = sshll.u32 %s3705_s19, 4  ;;  %s4469_s1 = sld [smem:[#allocation36_spill]]  ;;  %s3846_s20 = int_to_ptr.vmem [resolvable:$true] %s402_s20 }
  0x17   : > { %s4466_s15 = scalar_select %p3831_p3, 1, 0 }
  0x18   : > { %p2892_p5 = pneg %p3831_p3 }
  0x19   : > { %4467 = sst [smem:[#allocation34_spill]] %s4466_s15 }
  0x1a   : > { %p3842_p6 = pnand %p2892_p5, %p4455_p1 }
  0x1c   : > { %s3245_s23 = scalar_lea.hbm %s4469_s1, 16  ;;  %p3856_p8 = pneg %p3842_p6 }
  0x1d   : > { %p3246_p7 = scmp.ne.s32.totalorder %s4469_s1, %s3245_s23  ;;  %p3252_p11 = scmp.lt.u32.totalorder %s3245_s23, %s4469_s1 }
  0x1f   : > { %p3248_p9 = pnand %p3856_p8, %p3246_p7 }
  0x21   : > { %p3249_p10 = pneg %p3248_p9 }
  0x23   : > { %p3254_p12 = pnand %p3252_p11, %p3249_p10 }
  0x25   : > { %3257 = shalt.err (!%p3254_p12)
}
  0x26   : > { %s3258_s21 = scalar_lea.vmem %s3829_s30, 16  ;;  %s3265_s22 = scalar_lea.vmem %s3829_s30, 32 }
  0x27   : > { %p3259_p13 = scmp.ne.s32.totalorder %s3829_s30, %s3258_s21  ;;  %p3266_p5 = scmp.lt.s32.totalorder %s3829_s30, %s3829_s30 }
  0x28   : > { %p3267_p7 = scmp.lt.s32.totalorder %s3265_s22, %s3258_s21 }
  0x29   : > { %p3261_p0 = pnand %p3259_p13, %p3856_p8 }
  0x2a   : > { %p3268_p9 = por %p3267_p7, %p3266_p5 }
  0x2b   : > { %p3262_p2 = pneg %p3261_p0 }
  0x2d   : > { %p3269_p4 = pnand %p3268_p9, %p3262_p2 }
  0x2f   : > { %3272 = shalt.err (!%p3269_p4)
}
  0x30   : > { %2895 = dma.hbm_to_vmem [thread:$0]  (!%p3842_p6), %s4469_s1, 16, %s3829_s30, [#allocation6]  }
  0x31   : > { %s4471_s3 = sld [smem:[#allocation37_spill]] }
  0x37   : > { %s3273_s19 = scalar_lea.hbm %s4471_s3, 3072 }
  0x38   : > { %p3274_p10 = scmp.ne.s32.totalorder %s4471_s3, %s3273_s19  ;;  %p3280_p4 = scmp.lt.u32.totalorder %s3273_s19, %s4471_s3 }
  0x3a   : > { %p3276_p11 = pnand %p3274_p10, %p3856_p8 }
  0x3c   : > { %p3277_p12 = pneg %p3276_p11 }
  0x3e   : > { %p3282_p13 = pnand %p3280_p4, %p3277_p12 }
  0x40   : > { %3285 = shalt.err (!%p3282_p13)
}
  0x41   : > { %s3286_s30 = scalar_lea.vmem %s3838_s17, 3072  ;;  %p3294_p7 = scmp.lt.s32.totalorder %s3838_s17, %s3838_s17 }
  0x42   : > { %p3287_p0 = scmp.ne.s32.totalorder %s3838_s17, %s3286_s30  ;;  %p3295_p9 = scmp.lt.s32.totalorder %s3286_s30, %s3286_s30 }
  0x44   : > { %p3289_p2 = pnand %p3287_p0, %p3856_p8  ;;  %p3296_p10 = por %p3295_p9, %p3294_p7 }
  0x46   : > { %p3290_p5 = pneg %p3289_p2 }
  0x48   : > { %p3297_p11 = pnand %p3296_p10, %p3290_p5 }
  0x4a   : > { %3300 = shalt.err (!%p3297_p11)
}
  0x4b   : > { %s3706_s0 = smov 192   ;;  %s3707_s15 = smov 12  }
  0x4c   : > { %2901 = dma.hbm_to_vmem [thread:$0]  (!%p3842_p6), %s4471_s3, 3072, %s3838_s17, [#allocation9], %s3706_s0, %s3706_s0, %s3707_s15  }
  0x4d   : > { %s3301_s19 = scalar_lea.hbm %s4440_s5, 1024 }
  0x4e   : > { %p3302_p12 = scmp.ne.s32.totalorder %s4440_s5, %s3301_s19  ;;  %p3308_p0 = scmp.lt.u32.totalorder %s3301_s19, %s4440_s5 }
  0x50   : > { %p3304_p4 = pnand %p3302_p12, %p3856_p8 }
  0x52   : > { %p3305_p13 = pneg %p3304_p4 }
  0x54   : > { %p3310_p2 = pnand %p3308_p0, %p3305_p13 }
  0x56   : > { %3313 = shalt.err (!%p3310_p2)
}
  0x57   : > { %s3314_s17 = scalar_lea.vmem %s3846_s20, 1024  ;;  %p3322_p10 = scmp.lt.s32.totalorder %s3846_s20, %s3846_s20 }
  0x58   : > { %p3315_p5 = scmp.ne.s32.totalorder %s3846_s20, %s3314_s17  ;;  %p3323_p11 = scmp.lt.s32.totalorder %s3314_s17, %s3314_s17 }
  0x5a   : > { %p3317_p7 = pnand %p3315_p5, %p3856_p8  ;;  %p3324_p12 = por %p3323_p11, %p3322_p10 }
  0x5c   : > { %p3318_p9 = pneg %p3317_p7 }
  0x5e   : > { %p3325_p4 = pnand %p3324_p12, %p3318_p9 }
  0x60   : > { %3328 = shalt.err (!%p3325_p4)
}
  0x61   : > { %s4457_s0 = smov 64   ;;  %s4458_s1 = smov 4  }
  0x62   : > { %2907 = dma.hbm_to_vmem [thread:$0]  (!%p3842_p6), %s4440_s5, 1024, %s3846_s20, [#allocation12], %s4457_s0, %s4457_s0, %s4458_s1  }
  0x63   : > { %s3710_s23 = smov [#allocation14]   ;;  %s3711_s29 = smov [#allocation17]  }
  0x64   : > { %s427_s24 = sshll.u32 %s3710_s23, 4  ;;  %s448_s19 = sshll.u32 %s3711_s29, 4  ;;  %s428_s24 = int_to_ptr.vmem [resolvable:$true] %s427_s24  ;;  %s449_s19 = int_to_ptr.vmem [resolvable:$true] %s448_s19 }
  0x65   : > { %s3329_s30 = scalar_lea.hbm %s4442_s7, 16 }
  0x66   : > { %p3330_p13 = scmp.ne.s32.totalorder %s4442_s7, %s3329_s30  ;;  %p3336_p5 = scmp.lt.u32.totalorder %s3329_s30, %s4442_s7 }
  0x68   : > { %p3332_p0 = pnand %p3330_p13, %p3856_p8 }
  0x6a   : > { %p3333_p2 = pneg %p3332_p0 }
  0x6c   : > { %p3338_p7 = pnand %p3336_p5, %p3333_p2 }
  0x6e   : > { %3341 = shalt.err (!%p3338_p7)
}
  0x6f   : > { %s3342_s20 = scalar_lea.vmem %s428_s24, 16  ;;  %s3349_s15 = scalar_lea.vmem %s428_s24, 32 }
  0x70   : > { %p3343_p9 = scmp.ne.s32.totalorder %s428_s24, %s3342_s20  ;;  %p3350_p12 = scmp.lt.s32.totalorder %s428_s24, %s428_s24 }
  0x71   : > { %p3351_p4 = scmp.lt.s32.totalorder %s3349_s15, %s3342_s20 }
  0x72   : > { %p3345_p10 = pnand %p3343_p9, %p3856_p8 }
  0x73   : > { %p3352_p1 = por %p3351_p4, %p3350_p12 }
  0x74   : > { %p3346_p11 = pneg %p3345_p10 }
  0x76   : > { %p3353_p3 = pnand %p3352_p1, %p3346_p11 }
  0x78   : > { %3356 = shalt.err (!%p3353_p3)
}
  0x79   : > { %2913 = dma.hbm_to_vmem [thread:$0]  (!%p3842_p6), %s4442_s7, 16, %s428_s24, [#allocation15]  }
  0x7a   : > { %s3357_s23 = scalar_lea.hbm %s4444_s9, 4096 }
  0x7b   : > { %p3358_p13 = scmp.ne.s32.totalorder %s4444_s9, %s3357_s23  ;;  %p3364_p3 = scmp.lt.u32.totalorder %s3357_s23, %s4444_s9 }
  0x7d   : > { %p3360_p0 = pnand %p3358_p13, %p3856_p8 }
  0x7f   : > { %p3361_p1 = pneg %p3360_p0 }
  0x81   : > { %p3366_p2 = pnand %p3364_p3, %p3361_p1 }
  0x83   : > { %3369 = shalt.err (!%p3366_p2)
}
  0x84   : > { %s3370_s17 = scalar_lea.vmem %s449_s19, 4096  ;;  %p3378_p10 = scmp.lt.s32.totalorder %s449_s19, %s449_s19 }
  0x85   : > { %p3371_p5 = scmp.ne.s32.totalorder %s449_s19, %s3370_s17  ;;  %p3379_p11 = scmp.lt.s32.totalorder %s3370_s17, %s3370_s17 }
  0x87   : > { %p3373_p7 = pnand %p3371_p5, %p3856_p8  ;;  %p3380_p12 = por %p3379_p11, %p3378_p10 }
  0x89   : > { %p3374_p9 = pneg %p3373_p7 }
  0x8b   : > { %p3381_p4 = pnand %p3380_p12, %p3374_p9 }
  0x8d   : > { %3384 = shalt.err (!%p3381_p4)
}
  0x8e   : > { %s3712_s24 = smov 256   ;;  %s3713_s20 = smov 16  }
  0x8f   : > { %2919 = dma.hbm_to_vmem [thread:$0]  (!%p3842_p6), %s4444_s9, 4096, %s449_s19, [#allocation18], %s3712_s24, %s3712_s24, %s3713_s20  }
  0x90   : > { %s3714_s13 = smov [#allocation20]   ;;  %s3715_s14 = smov [#allocation7]  }
  0x91   : > { %s472_s25 = sshll.u32 %s3714_s13, 4  ;;  %s368_s23 = sshll.u32 %s3715_s14, 4  ;;  %s473_s25 = int_to_ptr.vmem [resolvable:$true] %s472_s25  ;;  %s369_s23 = int_to_ptr.vmem [resolvable:$true] %s368_s23 }
  0x92   : > { %s3385_s22 = scalar_lea.hbm %s4446_s11, 4096 }
  0x93   : > { %p3386_p13 = scmp.ne.s32.totalorder %s4446_s11, %s3385_s22  ;;  %p3392_p3 = scmp.lt.u32.totalorder %s3385_s22, %s4446_s11 }
  0x95   : > { %p3388_p0 = pnand %p3386_p13, %p3856_p8 }
  0x97   : > { %p3389_p1 = pneg %p3388_p0 }
  0x99   : > { %p3394_p2 = pnand %p3392_p3, %p3389_p1 }
  0x9b   : > { %3397 = shalt.err (!%p3394_p2)
}
  0x9c   : > { %s3398_s19 = scalar_lea.vmem %s473_s25, 4096  ;;  %p3406_p10 = scmp.lt.s32.totalorder %s473_s25, %s473_s25 }
  0x9d   : > { %p3399_p5 = scmp.ne.s32.totalorder %s473_s25, %s3398_s19  ;;  %p3407_p11 = scmp.lt.s32.totalorder %s3398_s19, %s3398_s19 }
  0x9f   : > { %p3401_p7 = pnand %p3399_p5, %p3856_p8  ;;  %p3408_p12 = por %p3407_p11, %p3406_p10 }
  0xa1   : > { %p3402_p9 = pneg %p3401_p7 }
  0xa3   : > { %p3409_p4 = pnand %p3408_p12, %p3402_p9 }
  0xa5   : > { %3412 = shalt.err (!%p3409_p4)
}
  0xa6   : > { %s4472_s24 = smov 4   ;;  %s4473_s20 = smov 64  }
  0xa7   : > { %2925 = dma.hbm_to_vmem [thread:$0]  (!%p3842_p6), %s4446_s11, 4096, %s473_s25, [#allocation21], %s4473_s20, %s4473_s20, %s4472_s24  }
  0xa8   : > { %s3413_s13 = scalar_lea.hbm %s4437_s2, 16 }
  0xa9   : > { %p3414_p13 = scmp.ne.s32.totalorder %s4437_s2, %s3413_s13  ;;  %p3420_p3 = scmp.lt.u32.totalorder %s3413_s13, %s4437_s2 }
  0xab   : > { %p3416_p0 = pnand %p3414_p13, %p3856_p8 }
  0xad   : > { %p3417_p1 = pneg %p3416_p0 }
  0xaf   : > { %p3422_p2 = pnand %p3420_p3, %p3417_p1 }
  0xb1   : > { %3425 = shalt.err (!%p3422_p2)
}
  0xb2   : > { %s3426_s30 = scalar_lea.vmem %s369_s23, 16  ;;  %s3433_s25 = scalar_lea.vmem %s369_s23, 32 }
  0xb3   : > { %p3427_p5 = scmp.ne.s32.totalorder %s369_s23, %s3426_s30  ;;  %p3434_p10 = scmp.lt.s32.totalorder %s369_s23, %s369_s23 }
  0xb4   : > { %p3435_p11 = scmp.lt.s32.totalorder %s3433_s25, %s3426_s30 }
  0xb5   : > { %p3429_p7 = pnand %p3427_p5, %p3856_p8 }
  0xb6   : > { %p3436_p12 = por %p3435_p11, %p3434_p10 }
  0xb7   : > { %p3430_p9 = pneg %p3429_p7 }
  0xb9   : > { %p3437_p4 = pnand %p3436_p12, %p3430_p9 }
  0xbb   : > { %3440 = shalt.err (!%p3437_p4)
}
  0xbc   : > { %2898 = dma.hbm_to_vmem [thread:$0]  (!%p3842_p6), %s4437_s2, 16, %s369_s23, [#allocation6]  }
  0xbd   : > { %s3716_s24 = smov [#allocation10]   ;;  %s3717_s0 = smov [#allocation13]  }
  0xbe   : > { %s392_s20 = sshll.u32 %s3716_s24, 4  ;;  %s416_s1 = sshll.u32 %s3717_s0, 4  ;;  %s393_s20 = int_to_ptr.vmem [resolvable:$true] %s392_s20  ;;  %s417_s1 = int_to_ptr.vmem [resolvable:$true] %s416_s1 }
  0xbf   : > { %s3441_s13 = scalar_lea.hbm %s4439_s4, 48 }
  0xc0   : > { %p3442_p13 = scmp.ne.s32.totalorder %s4439_s4, %s3441_s13  ;;  %p3448_p3 = scmp.lt.u32.totalorder %s3441_s13, %s4439_s4 }
  0xc2   : > { %p3444_p0 = pnand %p3442_p13, %p3856_p8 }
  0xc4   : > { %p3445_p1 = pneg %p3444_p0 }
  0xc6   : > { %p3450_p2 = pnand %p3448_p3, %p3445_p1 }
  0xc8   : > { %3453 = shalt.err (!%p3450_p2)
}
  0xc9   : > { %s3454_s23 = scalar_lea.vmem %s393_s20, 48  ;;  %s3461_s30 = scalar_lea.vmem %s393_s20, 64 }
  0xca   : > { %p3455_p5 = scmp.ne.s32.totalorder %s393_s20, %s3454_s23  ;;  %p3462_p10 = scmp.lt.s32.totalorder %s393_s20, %s393_s20 }
  0xcb   : > { %p3463_p11 = scmp.lt.s32.totalorder %s3461_s30, %s3454_s23 }
  0xcc   : > { %p3457_p7 = pnand %p3455_p5, %p3856_p8 }
  0xcd   : > { %p3464_p12 = por %p3463_p11, %p3462_p10 }
  0xce   : > { %p3458_p9 = pneg %p3457_p7 }
  0xd0   : > { %p3465_p4 = pnand %p3464_p12, %p3458_p9 }
  0xd2   : > { %3468 = shalt.err (!%p3465_p4)
}
  0xd3   : > { %2904 = dma.hbm_to_vmem [thread:$0]  (!%p3842_p6), %s4439_s4, 48, %s393_s20, [#allocation9]  }
  0xd4   : > { %s3469_s0 = scalar_lea.hbm %s4441_s6, 16 }
  0xd5   : > { %p3470_p13 = scmp.ne.s32.totalorder %s4441_s6, %s3469_s0  ;;  %p3476_p3 = scmp.lt.u32.totalorder %s3469_s0, %s4441_s6 }
  0xd7   : > { %p3472_p0 = pnand %p3470_p13, %p3856_p8 }
  0xd9   : > { %p3473_p1 = pneg %p3472_p0 }
  0xdb   : > { %p3478_p2 = pnand %p3476_p3, %p3473_p1 }
  0xdd   : > { %3481 = shalt.err (!%p3478_p2)
}
  0xde   : > { %s3482_s29 = scalar_lea.vmem %s417_s1, 16  ;;  %s3489_s20 = scalar_lea.vmem %s417_s1, 32 }
  0xdf   : > { %p3483_p5 = scmp.ne.s32.totalorder %s417_s1, %s3482_s29  ;;  %p3490_p10 = scmp.lt.s32.totalorder %s417_s1, %s417_s1 }
  0xe0   : > { %p3491_p11 = scmp.lt.s32.totalorder %s3489_s20, %s3482_s29 }
  0xe1   : > { %p3485_p7 = pnand %p3483_p5, %p3856_p8 }
  0xe2   : > { %p3492_p12 = por %p3491_p11, %p3490_p10 }
  0xe3   : > { %p3486_p9 = pneg %p3485_p7 }
  0xe5   : > { %p3493_p4 = pnand %p3492_p12, %p3486_p9 }
  0xe7   : > { %3496 = shalt.err (!%p3493_p4)
}
  0xe8   : > { %2910 = dma.hbm_to_vmem [thread:$0]  (!%p3842_p6), %s4441_s6, 16, %s417_s1, [#allocation12]  }
  0xe9   : > { %s3718_s23 = smov [#allocation16]   ;;  %s3719_s25 = smov [#allocation19]  }
  0xea   : > { %s438_s30 = sshll.u32 %s3718_s23, 4  ;;  %s462_s17 = sshll.u32 %s3719_s25, 4  ;;  %s439_s30 = int_to_ptr.vmem [resolvable:$true] %s438_s30  ;;  %s463_s17 = int_to_ptr.vmem [resolvable:$true] %s462_s17 }
  0xeb   : > { %s3497_s0 = scalar_lea.hbm %s4443_s8, 16 }
  0xec   : > { %p3498_p13 = scmp.ne.s32.totalorder %s4443_s8, %s3497_s0  ;;  %p3504_p3 = scmp.lt.u32.totalorder %s3497_s0, %s4443_s8 }
  0xee   : > { %p3500_p0 = pnand %p3498_p13, %p3856_p8 }
  0xf0   : > { %p3501_p1 = pneg %p3500_p0 }
  0xf2   : > { %p3506_p2 = pnand %p3504_p3, %p3501_p1 }
  0xf4   : > { %3509 = shalt.err (!%p3506_p2)
}
  0xf5   : > { %s3510_s1 = scalar_lea.vmem %s439_s30, 16  ;;  %s3517_s29 = scalar_lea.vmem %s439_s30, 32 }
  0xf6   : > { %p3511_p5 = scmp.ne.s32.totalorder %s439_s30, %s3510_s1  ;;  %p3518_p10 = scmp.lt.s32.totalorder %s439_s30, %s439_s30 }
  0xf7   : > { %p3519_p11 = scmp.lt.s32.totalorder %s3517_s29, %s3510_s1 }
  0xf8   : > { %p3513_p7 = pnand %p3511_p5, %p3856_p8 }
  0xf9   : > { %p3520_p12 = por %p3519_p11, %p3518_p10 }
  0xfa   : > { %p3514_p9 = pneg %p3513_p7 }
  0xfc   : > { %p3521_p4 = pnand %p3520_p12, %p3514_p9 }
  0xfe   : > { %3524 = shalt.err (!%p3521_p4)
}
  0xff   : > { %2916 = dma.hbm_to_vmem [thread:$0]  (!%p3842_p6), %s4443_s8, 16, %s439_s30, [#allocation15]  }
 0x100   : > { %s3525_s25 = scalar_lea.hbm %s4445_s10, 64 }
 0x101   : > { %p3526_p13 = scmp.ne.s32.totalorder %s4445_s10, %s3525_s25  ;;  %p3532_p3 = scmp.lt.u32.totalorder %s3525_s25, %s4445_s10 }
 0x103   : > { %p3528_p0 = pnand %p3526_p13, %p3856_p8 }
 0x105   : > { %p3529_p1 = pneg %p3528_p0 }
 0x107   : > { %p3534_p2 = pnand %p3532_p3, %p3529_p1 }
 0x109   : > { %3537 = shalt.err (!%p3534_p2)
}
 0x10a   : > { %s3538_s3 = scalar_lea.vmem %s463_s17, 64  ;;  %p3546_p10 = scmp.lt.s32.totalorder %s463_s17, %s463_s17 }
 0x10b   : > { %p3539_p5 = scmp.ne.s32.totalorder %s463_s17, %s3538_s3  ;;  %p3547_p11 = scmp.lt.s32.totalorder %s3538_s3, %s3538_s3 }
 0x10d   : > { %p3541_p7 = pnand %p3539_p5, %p3856_p8  ;;  %p3548_p12 = por %p3547_p11, %p3546_p10 }
 0x10f   : > { %p3542_p9 = pneg %p3541_p7 }
 0x111   : > { %p3549_p4 = pnand %p3548_p12, %p3542_p9 }
 0x113   : > { %3552 = shalt.err (!%p3549_p4)
}
 0x114   : > { %2922 = dma.hbm_to_vmem [thread:$0]  (!%p3842_p6), %s4445_s10, 64, %s463_s17, [#allocation18]  }
 0x115   : > { %s3720_s14 = smov [#allocation22]   ;;  %s3553_s21 = scalar_lea.hbm %s4447_s12, 16 }
 0x116   : > { %s486_s1 = sshll.u32 %s3720_s14, 4  ;;  %p3554_p13 = scmp.ne.s32.totalorder %s4447_s12, %s3553_s21  ;;  %s487_s1 = int_to_ptr.vmem [resolvable:$true] %s486_s1 }
 0x117   : > { %p3560_p3 = scmp.lt.u32.totalorder %s3553_s21, %s4447_s12 }
 0x118   : > { %p3556_p0 = pnand %p3554_p13, %p3856_p8 }
 0x11a   : > { %p3557_p1 = pneg %p3556_p0 }
 0x11c   : > { %p3562_p2 = pnand %p3560_p3, %p3557_p1 }
 0x11e   : > { %3565 = shalt.err (!%p3562_p2)
}
 0x11f   : > { %s3566_s17 = scalar_lea.vmem %s487_s1, 16  ;;  %s3573_s24 = scalar_lea.vmem %s487_s1, 32 }
 0x120   : > { %p3567_p5 = scmp.ne.s32.totalorder %s487_s1, %s3566_s17  ;;  %p3574_p10 = scmp.lt.s32.totalorder %s487_s1, %s487_s1 }
 0x121   : > { %p3575_p11 = scmp.lt.s32.totalorder %s3573_s24, %s3566_s17 }
 0x122   : > { %p3569_p7 = pnand %p3567_p5, %p3856_p8 }
 0x123   : > { %p3576_p12 = por %p3575_p11, %p3574_p10 }
 0x124   : > { %p3570_p9 = pneg %p3569_p7 }
 0x126   : > { %p3577_p4 = pnand %p3576_p12, %p3570_p9 }
 0x128   : > { %3580 = shalt.err (!%p3577_p4)
}
 0x129   : > { %s4474_s16 = sld [smem:[#allocation32_spill]]  ;;  %s4475_s3 = sld [smem:[#allocation33_spill]] }
 0x12a   : > { %2928 = dma.hbm_to_vmem [thread:$0]  (!%p3842_p6), %s4447_s12, 16, %s487_s1, [#allocation21]  }
 0x12b   : > { %s2524_s30 = sadd.s32 4294967294, %s3701_s28   ;;  %s4094_s18 = sadd.s32 1, %s3701_s28  }
 0x12c   : > { %s39_s13 = ssub.s32 %s3701_s28, %s4094_s18  ;;  %s42_s14 = sadd.s32 1, %s3697_s27 }
 0x12d   : > { %p40_p8 = scmp.eq.s32.totalorder %s39_s13, 0  ;;  %p49_p13 = scmp.ne.s32.totalorder %s3697_s27, %s3693_s26 }
 0x12e   : > { %p50_p0 = scmp.eq.s32.totalorder %s3701_s28, 0  ;;  %p337_p7 = scmp.eq.s32.totalorder %s2524_s30, 1 }
 0x12f   : > { %p55_p1 = scmp.ne.s32.totalorder %s3693_s26, %s4474_s16  ;;  %p4477_p2 = scmp.eq.s32.totalorder %s4475_s3, 0 }
 0x130   : > { %s4105_s29 = scalar_select %p40_p8, %s3697_s27, %s42_s14  }
 0x131   : > { %p4107_p3 = por %p50_p0, %p49_p13  ;;  %p4113_p6 = por %p4477_p2, %p55_p1 }
 0x132   : > { %p331_p5 = scmp.eq.s32.totalorder %s4475_s3, 1  ;;  %p2949_p9 = scmp.lt.s32.totalorder %s3701_s28, 2 }
 0x133   : > { %s497_s21 = sand.u32 1, %s3697_s27   ;;  %p4124_p11 = por %p337_p7, %p55_p1 }
 0x134   : > { %p4120_p10 = por %p331_p5, %p49_p13  ;;  %s2539_s25 = sshll.u32 %s497_s21, 4 }
 0x135   : > { %s4480_s23 = scalar_select %p4124_p11, 1, 0 }
 0x136   : > { %s4479_s22 = scalar_select %p4120_p10, 1, 0 }
 0x137   : > { %s2672_s19 = sshll.u32 %s3701_s28, 8  ;;  %s4481_s0 = sld [smem:[#allocation35_spill]] }
 0x138   : > { %s501_s16 = scalar_lea.vmem [#allocation2], %s2539_s25  ;;  %p4138_p12 = pnand %p2949_p9, %p4107_p3 }
 0x139   : > { %s508_s3 = sshll.u32 %s501_s16, 4  ;;  %s4142_s13 = scalar_lea.sflag [#allocation3], %s497_s21  ;;  %s4134_s3 = int_to_ptr.vmem [resolvable:$true] %s508_s3 }
 0x13a   : > { %p3583_p8 = pneg %p4138_p12 }
 0x13d   : > { %s4132_s15 = scalar_lea.hbm %s4481_s0, %s2672_s19  ;;  %s3586_s20 = scalar_lea.hbm %s4481_s0, 512 }
 0x13e   : > { %s3581_s14 = scalar_lea.hbm %s4132_s15, 256  ;;  %p3587_p1 = scmp.lt.u32.totalorder %s4132_s15, %s4481_s0 }
 0x13f   : > { %p3582_p4 = scmp.ne.s32.totalorder %s4132_s15, %s3581_s14  ;;  %p3588_p3 = scmp.lt.u32.totalorder %s3586_s20, %s3581_s14 }
 0x140   : > { %p3590_p5 = scmp.lt.u32.totalorder %s3581_s14, %s4132_s15 }
 0x141   : > { %p3584_p13 = pnand %p3583_p8, %p3582_p4  ;;  %p3589_p2 = por %p3588_p3, %p3587_p1 }
 0x143   : > { %p3585_p0 = pneg %p3584_p13  ;;  %p3591_p7 = por %p3590_p5, %p3589_p2 }
 0x145   : > { %p3592_p9 = pnand %p3591_p7, %p3585_p0 }
 0x147   : > { %3595 = shalt.err (!%p3592_p9)
}
 0x148   : > { %s3596_s21 = scalar_lea.vmem %s4134_s3, 256  ;;  %s3721_s16 = smov [#allocation2]  }
 0x149   : > { %p3597_p4 = scmp.ne.s32.totalorder %s4134_s3, %s3596_s21  ;;  %s3601_s25 = sshll.u32 %s3721_s16, 4  ;;  %s3602_s25 = int_to_ptr.vmem [resolvable:$false] %s3601_s25 }
 0x14a   : > { %s3603_s19 = scalar_lea.vmem %s3602_s25, 512  ;;  %p3604_p10 = scmp.lt.s32.totalorder %s4134_s3, %s3602_s25 }
 0x14b   : > { %p3599_p13 = pnand %p3597_p4, %p3583_p8  ;;  %p3605_p1 = scmp.lt.s32.totalorder %s3603_s19, %s3596_s21 }
 0x14d   : > { %p3600_p11 = pneg %p3599_p13  ;;  %p3606_p3 = por %p3605_p1, %p3604_p10 }
 0x14f   : > { %p3607_p2 = pnand %p3606_p3, %p3600_p11 }
 0x151   : > { %3610 = shalt.err (!%p3607_p2)
}
 0x152   : > { %s3722_s14 = smov 128   ;;  %s3723_s20 = smov 8  }
 0x153   : > { %2932 = dma.hbm_to_vmem [thread:$0]  (!%p4138_p12), %s4132_s15, 256, %s4134_s3, %s4142_s13, %s3722_s14, %s3722_s14, %s3723_s20  }
 0x154   : > { %s4483_s17 = sld [smem:[#allocation34_spill]] }
 0x15a   : > { %p4484_p8 = scmp.ne.s32.totalorder %s4483_s17, 0 }
 0x15b   : > { %s4173_s24 = sand.u32 (!%p4484_p8), 1, %s3693_s26  }
 0x15c   : > { %520 = sbr.rel (%p4484_p8) target bundleno = 2966 (0xb96), region = 72  ;;  %s2543_s21 = sshll.u32 (!%p4484_p8), %s4173_s24, 4 }
 0x15d   : > { %s523_s16 = scalar_lea.sflag (!%p4484_p8), [#allocation3], %s4173_s24  ;;  %s4179_s25 = scalar_lea.vmem (!%p4484_p8), [#allocation2], %s2543_s21 }
 0x163   : > { %3656 = dma.done.wait (%p4113_p6), %s523_s16, 256  }
 0x164   : > { %3658 = vsyncadd (%p4113_p6), %s523_s16, 4294967040  ;;  %s4485_s15 = sld [smem:[#allocation33_spill]] }
 0x16a   : > { %p4486_p10 = scmp.eq.s32.totalorder %s4485_s15, 0 }
 0x16c   : > { %3660 = dma.done.wait (%p4486_p10), [#allocation6], 32   ;;  %p4487_p11 = pmov %p4486_p10 }
 0x16d   : > { %p4488_p12 = pmov %p4486_p10 }
 0x16e   : > { %3662 = vsyncadd (%p4487_p11), [#allocation6], 4294967264 }
 0x16f   : > { %3664 = dma.done.wait (%p4488_p12), [#allocation9], 3120   ;;  %p4489_p0 = pmov %p4486_p10 }
 0x171   : > { %3666 = vsyncadd (%p4489_p0), [#allocation9], 4294964176  ;;  %p4490_p5 = pmov %p4489_p0 }
 0x172   : > { %p4491_p7 = pmov %p4489_p0 }
 0x173   : > { %3668 = dma.done.wait (%p4490_p5), [#allocation12], 1040  }
 0x174   : > { %3670 = vsyncadd (%p4491_p7), [#allocation12], 4294966256  ;;  %p4492_p6 = pmov %p4489_p0 }
 0x175   : > { %p4493_p9 = pmov %p4489_p0 }
 0x176   : > { %3672 = dma.done.wait (%p4492_p6), [#allocation15], 32  }
 0x177   : > { %3674 = vsyncadd (%p4493_p9), [#allocation15], 4294967264  ;;  %p4494_p4 = pmov %p4489_p0 }
 0x178   : > { %p4495_p13 = pmov %p4489_p0 }
 0x179   : > { %3676 = dma.done.wait (%p4494_p4), [#allocation18], 4160  }
 0x17a   : > { %3678 = vsyncadd (%p4495_p13), [#allocation18], 4294963136  ;;  %p4496_p1 = pmov %p4489_p0 }
 0x17b   : > { %p4497_p3 = pmov %p4489_p0 }
 0x17c   : > { %3680 = dma.done.wait (%p4496_p1), [#allocation21], 4112  }
 0x17d   : > { %3682 = vsyncadd (%p4497_p3), [#allocation21], 4294963184  ;;  %v618_v0 = vld [vmem:[%s4179_s25] sm:$0xff]  ;;  %v619_v1 = vld [vmem:[%s4179_s25 + $0x8] sm:$0xff]  ;;  %v3724_v4 = vmov 0.0   ;;  %v3725_v30 = vmov 0   ;;  %v696_v53 = vlaneseq }
 0x17e   : > { %622 = vadd.xlane.f32.xlu0 %v618_v0  ;;  %v3083_v2 = vld [vmem:[#allocation8 + $0x4] ss:$12 sps:$4 sm:$0xff]   ;;  %v3085_v3 = vld [vmem:[#allocation8] ss:$12 sps:$4 sm:$0xff]   ;;  %2752 = vmatprep.subr.bf16.mxu1 %v3724_v4  ;;  %v3086_v5 = vld [vmem:[#allocation8 + $0x8] ss:$12 sps:$4 sm:$0xff]  }
 0x17f   : > { %v3087_v6 = vld [vmem:[#allocation8 + $0x1c] ss:$12 sps:$4 sm:$0xff]   ;;  %839 = vmatprep.subr.bf16.mxu0 %v3083_v2  ;;  %2753 = vmatpush3.bf16.msra.mxu1 %v3086_v5  ;;  %v3089_v15 = vld [vmem:[#allocation8 + $0x18] ss:$12 sps:$4 sm:$0xff]   ;;  %v3090_v16 = vld [vmem:[#allocation8 + $0x20] ss:$12 sps:$4 sm:$0xff]  }
 0x180   : > { %840 = vmatpush1.bf16.msra.mxu0 %v3085_v3  ;;  %2754 = vmatprep.subr.bf16.mxu1 %v3724_v4  ;;  %v3091_v17 = vld [vmem:[#allocation8 + $0x34] ss:$12 sps:$4 sm:$0xff]   ;;  %v3093_v18 = vld [vmem:[#allocation8 + $0x30] ss:$12 sps:$4 sm:$0xff]   ;;  %v3094_v19 = vld [vmem:[#allocation8 + $0x38] ss:$12 sps:$4 sm:$0xff]  }
 0x181   : > { %841 = vmatprep.subr.bf16.mxu0 %v3087_v6  ;;  %v3095_v20 = vld [vmem:[#allocation8 + $0x4c] ss:$12 sps:$4 sm:$0xff]   ;;  %v3097_v21 = vld [vmem:[#allocation8 + $0x48] ss:$12 sps:$4 sm:$0xff]   ;;  %v3098_v22 = vld [vmem:[#allocation8 + $0x50] ss:$12 sps:$4 sm:$0xff]   ;;  %871 = vmatprep.mubr.bf16.mxu0 %v3725_v30 }
 0x182   : > { %624 = vadd.xlane.f32.xlu0 %v619_v1  ;;  %v3099_v23 = vld [vmem:[#allocation8 + $0x64] ss:$12 sps:$4 sm:$0xff]   ;;  %v3101_v24 = vld [vmem:[#allocation8 + $0x60] ss:$12 sps:$4 sm:$0xff]   ;;  %v3102_v25 = vld [vmem:[#allocation8 + $0x68] ss:$12 sps:$4 sm:$0xff]  }
 0x183   : > { %2755 = vmatpush3.bf16.msra.mxu1 %v3090_v16  ;;  %v3103_v26 = vld [vmem:[#allocation8 + $0x7c] ss:$12 sps:$4 sm:$0xff]   ;;  %v3105_v27 = vld [vmem:[#allocation8 + $0x78] ss:$12 sps:$4 sm:$0xff]   ;;  %v3106_v28 = vld [vmem:[#allocation8 + $0x80] ss:$12 sps:$4 sm:$0xff]  }
 0x184   : > { %842 = vmatpush1.bf16.msra.mxu0 %v3089_v15  ;;  %2756 = vmatprep.subr.bf16.mxu1 %v3724_v4  ;;  %v3107_v29 = vld [vmem:[#allocation8 + $0x94] ss:$12 sps:$4 sm:$0xff]   ;;  %vm3726_vm0 = vmmov 0   ;;  %v3109_v31 = vld [vmem:[#allocation8 + $0x90] ss:$12 sps:$4 sm:$0xff]   ;;  %v4239_v54 = vshrl.u32 %v696_v53, 7 }
 0x185   : > { %843 = vmatprep.subr.bf16.mxu0 %v3091_v17  ;;  %2768 = vmatprep.mubr.msk.bf16.mxu1 %vm3726_vm0, %v3724_v4  ;;  %v3110_v32 = vld [vmem:[#allocation8 + $0x98] ss:$12 sps:$4 sm:$0xff]   ;;  %v3113_v34 = vld [vmem:[#allocation8 + $0xa8] ss:$12 sps:$4 sm:$0xff]   ;;  %v3114_v35 = vld [vmem:[#allocation8 + $0xb0] ss:$12 sps:$4 sm:$0xff]  }
 0x186   : > { %v3111_v33 = vld [vmem:[#allocation8 + $0xac] ss:$12 sps:$4 sm:$0xff]   ;;  %v2557_v44 = vld [vmem:[#allocation5] ss:$0 sm:$0xff]  ;;  %v2558_v48 = vld [vmem:[#allocation7] ss:$0 sm:$0xff] }
 0x187   : > { %2757 = vmatpush3.bf16.msra.mxu1 %v3094_v19  ;;  %v698_v55 = vsub.s32 0, %v4239_v54  ;;  %v694_v56 = vld [vmem:[#allocation10] sm:$0x7]  ;;  %v706_v57 = vsub.s32 2, %v4239_v54  ;;  %v702_v58 = vsub.s32 1, %v4239_v54  ;;  %vm997_vm1 = vcmask 261120  }
 0x188   : > { %844 = vmatpush1.bf16.msra.mxu0 %v3093_v18  ;;  %2758 = vmatprep.subr.bf16.mxu1 %v3724_v4  ;;  %s3727_s1 = smov 96   ;;  %s3728_s3 = smov 32   ;;  %vm1205_vm3 = vcmask 130048   ;;  %vm1500_vm5 = vcmask 523264   ;;  %vm1503_vm6 = vcmask 785408  }
 0x189   : > { %845 = vmatprep.subr.bf16.mxu0 %v3095_v20  ;;  %v699_v59 = vrot.slane %v694_v56, %v698_v55  ;;  %v707_v60 = vrot.slane %v694_v56, %v706_v57  ;;  %v703_v63 = vrot.slane %v694_v56, %v702_v58  ;;  %s3729_s30 = smov 64   ;;  %s616_s13 = scalar_lea.vmem [#allocation23], %s2543_s21 }
 0x18a   : > { %s2337_s19 = sshll.u32 %s616_s13, 4  ;;  %s2673_s14 = sshll.u32 %s4485_s15, 8  ;;  %s4385_s19 = int_to_ptr.vmem [resolvable:$true] %s2337_s19 }
 0x18b   : > { %2759 = vmatpush3.bf16.msra.mxu1 %v3098_v22  ;;  %s4498_s16 = sld [smem:[#allocation38_spill]]  ;;  %s2324_s21 = scalar_lea.sflag [#allocation4], %s4173_s24 }
 0x18c   : > { %846 = vmatpush1.bf16.msra.mxu0 %v3097_v21  ;;  %2760 = vmatprep.subr.bf16.mxu1 %v3724_v4  ;;  %p4499_p8 = scmp.ne.s32.totalorder %s4479_s22, 0  ;;  %s3730_s15 = smov [#allocation23]  }
 0x18d   : > { %847 = vmatprep.subr.bf16.mxu0 %v3099_v23 }
 0x18f   : > { %2761 = vmatpush3.bf16.msra.mxu1 %v3102_v25 }
 0x190   : > { %848 = vmatpush1.bf16.msra.mxu0 %v3101_v24  ;;  %2762 = vmatprep.subr.bf16.mxu1 %v3724_v4 }
 0x191   : > { %849 = vmatprep.subr.bf16.mxu0 %v3103_v26 }
 0x193   : > { %2763 = vmatpush3.bf16.msra.mxu1 %v3106_v28 }
 0x194   : > { %850 = vmatpush1.bf16.msra.mxu0 %v3105_v27  ;;  %2764 = vmatprep.subr.bf16.mxu1 %v3724_v4 }
 0x195   : > { %851 = vmatprep.subr.bf16.mxu0 %v3107_v29 }
 0x197   : > { %2765 = vmatpush3.bf16.msra.mxu1 %v3110_v32 }
 0x198   : > { %852 = vmatpush1.bf16.msra.mxu0 %v3109_v31  ;;  %2766 = vmatprep.subr.bf16.mxu1 %v3724_v4 }
 0x199   : > { %853 = vmatprep.subr.bf16.mxu0 %v3111_v33 }
 0x19b   : > { %2767 = vmatpush3.bf16.msra.mxu1 %v3114_v35 }
 0x19c   : > { %854 = vmatpush1.bf16.msra.mxu0 %v3113_v34  ;;  %2772 = vmatprep.subr.bf16.mxu1 %v3724_v4 }
 0x19d   : > { %2796 = vmatprep.subr.bf16.mxu0 %v3724_v4 }
 0x20b   : > { %v623_v7 = vpop.xlane.xlu0 %622 }
 0x20c   : > { %v627_v8 = vmul.f32 0.0078125, %v623_v7 }
 0x20e   : > { %v4213_v9 = vsub.f32 %v618_v0, %v627_v8 }
 0x20f   : > { %v625_v10 = vpop.xlane.xlu0 %624 }
 0x210   : > { %v628_v11 = vmul.f32 0.0078125, %v625_v10  ;;  %v631_v12 = vmul.f32 %v4213_v9, %v4213_v9 }
 0x212   : > { %v4217_v13 = vsub.f32 %v619_v1, %v628_v11  ;;  %633 = vadd.xlane.f32.xlu1 %v631_v12 }
 0x214   : > { %v632_v14 = vmul.f32 %v4217_v13, %v4217_v13 }
 0x216   : > { %635 = vadd.xlane.f32.xlu1 %v632_v14 }
 0x29f   : > { %v634_v36 = vpop.xlane.xlu1 %633 }
 0x2a0   : > { %v637_v37 = vmul.f32 0.0078125, %v634_v36 }
 0x2a2   : > { %v639_v38 = vadd.f32 1e-05, %v637_v37 }
 0x2a3   : > { %v636_v39 = vpop.xlane.xlu1 %635 }
 0x2a4   : > { %3203 = vrsqrt.f32 %v639_v38  ;;  %v638_v40 = vmul.f32 0.0078125, %v636_v39 }
 0x2a6   : > { %v640_v41 = vadd.f32 1e-05, %v638_v40 }
 0x2a8   : > { %3205 = vrsqrt.f32 %v640_v41 }
 0x2ae   : > { %v3204_v42 = vpop.eup %3203 }
 0x2af   : > { %v643_v43 = vmul.f32 %v3204_v42, %v4213_v9 }
 0x2b1   : > { %v651_v47 = vmul.f32 %v2557_v44, %v643_v43 }
 0x2b2   : > { %v3206_v45 = vpop.eup %3205 }
 0x2b3   : > { %v644_v46 = vmul.f32 %v3206_v45, %v4217_v13  ;;  %v659_v50 = vadd.f32 %v2558_v48, %v651_v47 }
 0x2b5   : > { %v652_v49 = vmul.f32 %v2557_v44, %v644_v46 }
 0x2b7   : > { %v660_v51 = vadd.f32 %v2558_v48, %v652_v49 }
 0x2b9   : > { %v661_v52 = vpack.c.bf16 %v660_v51, %v659_v50  ;;  %v1190_v50 = vand.u32 127, %v696_v53  ;;  %v1188_v51 = vadd.s32 8, %v4239_v54 }
 0x2bb   : > { %872 = vmatmul.mubr.bf16.vlgmr.msra.gmra.mrb[0].mxu0 %v661_v52  ;;  %2769 = vmatmul.mubr.bf16.vlgmr.msra.gmra.mrb[0].mxu1 %v661_v52  ;;  %vm1191_vm2 = vcmp.le.s32.totalorder %v1190_v50, %v4239_v54  ;;  %vm1192_vm4 = vcmp.le.s32.totalorder %v1190_v50, %v1188_v51 }
 0x2bc   : > { %2774 = vmatprep.mubr.msk.bf16.mxu1 %vm3726_vm0, %v3724_v4  ;;  %2798 = vmatprep.mubr.msk.bf16.mxu0 %vm3726_vm0, %v3724_v4 }
 0x38e   : > { %v873_v61 = vpop.f32.mrb[0].mxu0  ;;  %v916_v62 = vpop.f32.mrb[0].mxu1 }
 0x38f   : > { %v874_v0 = vadd.f32 %v873_v61, %v699_v59  ;;  %v875_v1 = vpop.f32.mrb[1].mxu0  ;;  %v2770_v2 = vpop.f32.mrb[1].mxu1  ;;  %v917_v6 = vadd.f32 %v916_v62, %v707_v60 }
 0x390   : > { %v877_v3 = vpop.f32.mrb[2].mxu0  ;;  %v919_v5 = vpop.f32.mrb[2].mxu1  ;;  %v876_v12 = vadd.f32 %v875_v1, %v703_v63 }
 0x391   : > { %v878_v7 = vadd.f32 %v877_v3, %v699_v59  ;;  %v920_v8 = vadd.f32 %v919_v5, %v707_v60  ;;  %v879_v9 = vpop.f32.mrb[3].mxu0  ;;  %v2771_v10 = vpop.f32.mrb[3].mxu1  ;;  %v923_v11 = vmul.f32 0.17677669, %v874_v0 }
 0x392   : > { %v880_v13 = vadd.f32 %v879_v9, %v703_v63 }
 0x393   : > { %v924_v14 = vmul.f32 0.17677669, %v878_v7  ;;  %v993_v15 = vpack.c.bf16 %v920_v8, %v917_v6  ;;  %v4250_v16 = vpack.i.bf16 %v920_v8, %v917_v6 }
 0x394   : > { %v3023_v17 = vpack.i.bf16 %v880_v13, %v876_v12  ;;  %v969_v18 = vpack.c.bf16 %v880_v13, %v876_v12 }
 0x395   : > { %v945_v19 = vpack.c.bf16 %v924_v14, %v923_v11  ;;  %2797 = vmatpush3.bf16.msra.mxu0 %v993_v15  ;;  %v3028_v20 = vpack.i.bf16 %v924_v14, %v923_v11 }
 0x396   : > { %3024 = vrot.lane.b32.xlu0 %v3023_v17, %s3727_s1  ;;  %v1002_v21 = vsel %vm997_vm1, %v969_v18, 0  ;;  %2808 = vmatprep.subr.bf16.mxu0 %v3724_v4 }
 0x397   : > { %2773 = vmatpush3.bf16.xpose.msra.mxu1 %v1002_v21  ;;  %3029 = vrot.lane.b32.xlu1 %v3028_v20, %s3727_s1 }
 0x398   : > { %2778 = vmatprep.subr.bf16.mxu1 %v3724_v4 }
 0x39a   : > { %3044 = vrot.lane.b32.xlu0 %v3023_v17, %s3728_s3 }
 0x39b   : > { %3034 = vrot.lane.b32.xlu1 %v3023_v17, %s3729_s30 }
 0x39e   : > { %2775 = vmatmul.mubr.msk.bf16.vlgmr.msra.gmra.mrb[4].mxu1 %vm997_vm1, %v945_v19 }
 0x39f   : > { %3039 = vrot.lane.b32.xlu1 %v3028_v20, %s3729_s30  ;;  %2780 = vmatprep.mubr.msk.bf16.mxu1 %vm3726_vm0, %v3724_v4 }
 0x3a3   : > { %3049 = vrot.lane.b32.xlu1 %v3028_v20, %s3728_s3 }
 0x408   : > { %v3025_v22 = vpop.permute.xlu0 %3024 }
 0x409   : > { %v3027_v23 = vunpack.i.h.bf16 %v3025_v22  ;;  %v3026_v24 = vunpack.i.l.bf16 %v3025_v22  ;;  %v3030_v25 = vpop.permute.xlu1 %3029 }
 0x40a   : > { %v3032_v32 = vunpack.i.h.bf16 %v3030_v25  ;;  %v3031_v33 = vunpack.i.l.bf16 %v3030_v25 }
 0x40b   : > { %v970_v26 = vpack.c.bf16 %v3027_v23, %v3026_v24 }
 0x40c   : > { %v3045_v35 = vpop.permute.xlu0 %3044  ;;  %v946_v36 = vpack.c.bf16 %v3032_v32, %v3031_v33 }
 0x40d   : > { %v3035_v27 = vpop.permute.xlu1 %3034  ;;  %v1049_v28 = vsel %vm997_vm1, %v970_v26, 0  ;;  %v3047_v38 = vunpack.i.h.bf16 %v3045_v35  ;;  %v3046_v39 = vunpack.i.l.bf16 %v3045_v35 }
 0x40e   : > { %v3037_v29 = vunpack.i.h.bf16 %v3035_v27  ;;  %v3036_v31 = vunpack.i.l.bf16 %v3035_v27  ;;  %2779 = vmatpush3.bf16.xpose.msra.mxu1 %v1049_v28 }
 0x40f   : > { %2784 = vmatprep.subr.bf16.mxu1 %v3724_v4  ;;  %v972_v43 = vpack.c.bf16 %v3047_v38, %v3046_v39 }
 0x410   : > { %v971_v34 = vpack.c.bf16 %v3037_v29, %v3036_v31 }
 0x411   : > { %v3040_v37 = vpop.permute.xlu1 %3039  ;;  %v1143_v46 = vsel %vm997_vm1, %v972_v43, 0 }
 0x412   : > { %v1096_v40 = vsel %vm997_vm1, %v971_v34, 0  ;;  %v3042_v41 = vunpack.i.h.bf16 %v3040_v37  ;;  %v3041_v42 = vunpack.i.l.bf16 %v3040_v37 }
 0x414   : > { %v947_v44 = vpack.c.bf16 %v3042_v41, %v3041_v42 }
 0x415   : > { %2781 = vmatmul.mubr.msk.bf16.vlgmr.msra.gmra.mrb[8].mxu1 %vm997_vm1, %v946_v36  ;;  %v3050_v45 = vpop.permute.xlu1 %3049 }
 0x416   : > { %2785 = vmatpush3.bf16.xpose.msra.mxu1 %v1096_v40  ;;  %2786 = vmatprep.mubr.msk.bf16.mxu1 %vm3726_vm0, %v3724_v4  ;;  %v3052_v47 = vunpack.i.h.bf16 %v3050_v45  ;;  %v3051_v48 = vunpack.i.l.bf16 %v3050_v45 }
 0x417   : > { %2790 = vmatprep.subr.bf16.mxu1 %v3724_v4 }
 0x418   : > { %v948_v49 = vpack.c.bf16 %v3052_v47, %v3051_v48 }
 0x41d   : > { %2787 = vmatmul.mubr.msk.bf16.vlgmr.msra.gmra.mrb[12].mxu1 %vm997_vm1, %v947_v44 }
 0x41e   : > { %2791 = vmatpush3.bf16.xpose.msra.mxu1 %v1143_v46  ;;  %2792 = vmatprep.mubr.msk.bf16.mxu1 %vm3726_vm0, %v3724_v4 }
 0x41f   : > { %2802 = vmatprep.subr.bf16.mxu1 %v3724_v4 }
 0x425   : > { %2793 = vmatmul.mubr.msk.bf16.vlgmr.msra.gmra.mrb[16].mxu1 %vm997_vm1, %v948_v49 }
 0x426   : > { %2804 = vmatprep.mubr.msk.bf16.mxu1 %vm3726_vm0, %v3724_v4 }
 0x471   : > { %v1038_v52 = vpop.f32.mrb[4].mxu1 }
 0x472   : > { %v1197_v56 = vsel %vm1191_vm2, %v1038_v52, -1e+30  ;;  %v2776_v59 = vpop.f32.mrb[5].mxu1 }
 0x473   : > { %v1041_v60 = vpop.f32.mrb[6].mxu1  ;;  %v1206_v61 = vsel %vm1205_vm3, %v1197_v56, -inf }
 0x474   : > { %v1198_v62 = vsel %vm1192_vm4, %v1041_v60, -1e+30  ;;  %1207 = vmax.xlane.f32.xlu0 %v1206_v61  ;;  %v2777_v63 = vpop.f32.mrb[7].mxu1 }
 0x475   : > { %v1209_v53 = vsel %vm1205_vm3, %v1198_v62, -inf }
 0x476   : > { %1210 = vmax.xlane.f32.xlu1 %v1209_v53 }
 0x4e8   : > { %v1085_v0 = vpop.f32.mrb[8].mxu1 }
 0x4e9   : > { %v1199_v1 = vsel %vm1191_vm2, %v1085_v0, -1e+30  ;;  %v2782_v2 = vpop.f32.mrb[9].mxu1 }
 0x4ea   : > { %v1088_v3 = vpop.f32.mrb[10].mxu1  ;;  %v1212_v5 = vsel %vm1205_vm3, %v1199_v1, -inf }
 0x4eb   : > { %v1200_v6 = vsel %vm1192_vm4, %v1088_v3, -1e+30  ;;  %1213 = vmax.xlane.f32.xlu0 %v1212_v5  ;;  %v2783_v7 = vpop.f32.mrb[11].mxu1 }
 0x4ec   : > { %v1215_v8 = vsel %vm1205_vm3, %v1200_v6, -inf }
 0x4ef   : > { %1216 = vmax.xlane.f32.xlu0 %v1215_v8 }
 0x4f0   : > { %v1132_v9 = vpop.f32.mrb[12].mxu1 }
 0x4f1   : > { %v1201_v10 = vsel %vm1191_vm2, %v1132_v9, -1e+30  ;;  %v2788_v11 = vpop.f32.mrb[13].mxu1 }
 0x4f2   : > { %v1135_v12 = vpop.f32.mrb[14].mxu1  ;;  %v1218_v13 = vsel %vm1205_vm3, %v1201_v10, -inf }
 0x4f3   : > { %v1202_v14 = vsel %vm1192_vm4, %v1135_v12, -1e+30  ;;  %1219 = vmax.xlane.f32.xlu0 %v1218_v13  ;;  %v2789_v15 = vpop.f32.mrb[15].mxu1 }
 0x4f4   : > { %v1221_v17 = vsel %vm1205_vm3, %v1202_v14, -inf }
 0x4f5   : > { %1222 = vmax.xlane.f32.xlu1 %v1221_v17 }
 0x4f8   : > { %v1179_v18 = vpop.f32.mrb[16].mxu1 }
 0x4f9   : > { %v1203_v19 = vsel %vm1191_vm2, %v1179_v18, -1e+30  ;;  %v2794_v20 = vpop.f32.mrb[17].mxu1 }
 0x4fa   : > { %v1182_v21 = vpop.f32.mrb[18].mxu1  ;;  %v1224_v22 = vsel %vm1205_vm3, %v1203_v19, -inf }
 0x4fb   : > { %v4301_v23 = vsel %vm1192_vm4, %v1182_v21, -1e+30  ;;  %1225 = vmax.xlane.f32.xlu0 %v1224_v22  ;;  %v2795_v24 = vpop.f32.mrb[19].mxu1 }
 0x4fc   : > { %v1227_v25 = vsel %vm1205_vm3, %v4301_v23, -inf }
 0x4fd   : > { %1228 = vmax.xlane.f32.xlu1 %v1227_v25 }
 0x501   : > { %v1208_v26 = vpop.xlane.xlu0 %1207 }
 0x502   : > { %v1230_v27 = vsub.f32 %v1197_v56, %v1208_v26 }
 0x503   : > { %v1211_v28 = vpop.xlane.xlu1 %1210 }
 0x504   : > { %v1238_v29 = vmul.f32 1.442695, %v1230_v27  ;;  %v1231_v31 = vsub.f32 %v1198_v62, %v1211_v28 }
 0x506   : > { %3207 = vpow2.f32 %v1238_v29  ;;  %v1240_v32 = vmul.f32 1.442695, %v1231_v31 }
 0x508   : > { %3209 = vpow2.f32 %v1240_v32 }
 0x510   : > { %v3208_v33 = vpop.eup %3207 }
 0x511   : > { %v1254_v34 = vsel %vm1205_vm3, %v3208_v33, 0.0 }
 0x512   : > { %v3210_v35 = vpop.eup %3209  ;;  %1255 = vadd.xlane.f32.xlu0 %v1254_v34 }
 0x513   : > { %v1257_v36 = vsel %vm1205_vm3, %v3210_v35, 0.0 }
 0x514   : > { %1258 = vadd.xlane.f32.xlu1 %v1257_v36 }
 0x578   : > { %v1214_v37 = vpop.xlane.xlu0 %1213 }
 0x579   : > { %v1232_v38 = vsub.f32 %v1199_v1, %v1214_v37 }
 0x57b   : > { %v1242_v39 = vmul.f32 1.442695, %v1232_v38 }
 0x57c   : > { %v1217_v40 = vpop.xlane.xlu0 %1216 }
 0x57d   : > { %3211 = vpow2.f32 %v1242_v39  ;;  %v1233_v41 = vsub.f32 %v1200_v6, %v1217_v40 }
 0x57f   : > { %v1244_v42 = vmul.f32 1.442695, %v1233_v41 }
 0x580   : > { %v1220_v43 = vpop.xlane.xlu0 %1219 }
 0x581   : > { %3213 = vpow2.f32 %v1244_v42  ;;  %v1234_v44 = vsub.f32 %v1201_v10, %v1220_v43 }
 0x582   : > { %v1223_v45 = vpop.xlane.xlu1 %1222 }
 0x583   : > { %v1246_v46 = vmul.f32 1.442695, %v1234_v44  ;;  %v1235_v47 = vsub.f32 %v1202_v14, %v1223_v45 }
 0x585   : > { %3215 = vpow2.f32 %v1246_v46  ;;  %v1248_v48 = vmul.f32 1.442695, %v1235_v47 }
 0x587   : > { %v4307_v49 = vpop.eup %3211  ;;  %3217 = vpow2.f32 %v1248_v48 }
 0x588   : > { %v1226_v50 = vpop.xlane.xlu0 %1225  ;;  %v1260_v51 = vsel %vm1205_vm3, %v4307_v49, 0.0 }
 0x589   : > { %v1236_v52 = vsub.f32 %v1203_v19, %v1226_v50  ;;  %1261 = vadd.xlane.f32.xlu0 %v1260_v51 }
 0x58a   : > { %v1229_v2 = vpop.xlane.xlu1 %1228 }
 0x58b   : > { %v3214_v56 = vpop.eup %3213  ;;  %v1250_v59 = vmul.f32 1.442695, %v1236_v52  ;;  %v1237_v11 = vsub.f32 %v4301_v23, %v1229_v2 }
 0x58c   : > { %v1263_v60 = vsel %vm1205_vm3, %v3214_v56, 0.0 }
 0x58d   : > { %3219 = vpow2.f32 %v1250_v59  ;;  %1264 = vadd.xlane.f32.xlu1 %v1263_v60  ;;  %v1252_v12 = vmul.f32 1.442695, %v1237_v11  ;;  %v3116_v59 = vld [vmem:[#allocation11 + $0x8] sm:$0xff]   ;;  %v3122_v11 = vld [vmem:[#allocation11 + $0x38] sm:$0xff]  }
 0x58f   : > { %v3216_v61 = vpop.eup %3215 }
 0x590   : > { %v1266_v62 = vsel %vm1205_vm3, %v3216_v61, 0.0 }
 0x591   : > { %v3218_v63 = vpop.eup %3217  ;;  %1267 = vadd.xlane.f32.xlu0 %v1266_v62 }
 0x592   : > { %v1269_v53 = vsel %vm1205_vm3, %v3218_v63, 0.0 }
 0x593   : > { %1270 = vadd.xlane.f32.xlu1 %v1269_v53  ;;  %v3117_v53 = vld [vmem:[#allocation11 + $0x10] sm:$0xff]  }
 0x597   : > { %v4314_v0 = vpop.eup %3219 }
 0x598   : > { %v1272_v1 = vsel %vm1205_vm3, %v4314_v0, 0.0 }
 0x599   : > { %1273 = vadd.xlane.f32.xlu0 %v1272_v1 }
 0x59f   : > { %v1256_v3 = vpop.xlane.xlu0 %1255 }
 0x5a0   : > { %3221 = vrcp.f32 %v1256_v3 }
 0x5a1   : > { %v1259_v5 = vpop.xlane.xlu1 %1258 }
 0x5a2   : > { %3223 = vrcp.f32 %v1259_v5 }
 0x5a3   : > { %3225 = vpow2.f32 %v1252_v12 }
 0x5a4   : > { %3059 = vrot.lane.b32.xlu1 %v4250_v16, %s3729_s30 }
 0x5aa   : > { %v3222_v6 = vpop.eup %3221 }
 0x5ab   : > { %v1286_v8 = vmul.f32 %v3222_v6, %v3208_v33 }
 0x5ac   : > { %v3224_v7 = vpop.eup %3223 }
 0x5ad   : > { %v1287_v9 = vmul.f32 %v3224_v7, %v3210_v35  ;;  %v3226_v13 = vpop.eup %3225  ;;  %v3118_v7 = vld [vmem:[#allocation11 + $0x18] sm:$0xff]  }
 0x5ae   : > { %v1275_v14 = vsel %vm1205_vm3, %v3226_v13, 0.0 }
 0x5af   : > { %3054 = vrot.lane.b32.xlu0 %v4250_v16, %s3727_s1  ;;  %v1294_v10 = vpack.c.bf16 %v1287_v9, %v1286_v8  ;;  %v3119_v8 = vld [vmem:[#allocation11 + $0x20] sm:$0xff]   ;;  %v3120_v9 = vld [vmem:[#allocation11 + $0x28] sm:$0xff]  }
 0x5b1   : > { %2799 = vmatmul.mubr.msk.bf16.vlgmr.msra.gmra.mrb[4].mxu0 %vm1205_vm3, %v1294_v10  ;;  %v3121_v10 = vld [vmem:[#allocation11 + $0x30] sm:$0xff]  }
 0x5b2   : > { %2810 = vmatprep.mubr.msk.bf16.mxu0 %vm3726_vm0, %v3724_v4 }
 0x5c8   : > { %1276 = vadd.xlane.f32.xlu1 %v1275_v14 }
 0x5d9   : > { %3064 = vrot.lane.b32.xlu1 %v4250_v16, %s3728_s3 }
 0x616   : > { %v1262_v15 = vpop.xlane.xlu0 %1261 }
 0x61a   : > { %v1265_v17 = vpop.xlane.xlu1 %1264 }
 0x61b   : > { %3227 = vrcp.f32 %v1265_v17 }
 0x61e   : > { %v1268_v18 = vpop.xlane.xlu0 %1267 }
 0x61f   : > { %3229 = vrcp.f32 %v1268_v18 }
 0x620   : > { %3231 = vrcp.f32 %v1262_v15  ;;  %v1271_v19 = vpop.xlane.xlu1 %1270 }
 0x621   : > { %3233 = vrcp.f32 %v1271_v19 }
 0x624   : > { %v3060_v20 = vpop.permute.xlu1 %3059 }
 0x625   : > { %v3062_v21 = vunpack.i.h.bf16 %v3060_v20  ;;  %v3061_v22 = vunpack.i.l.bf16 %v3060_v20  ;;  %v3228_v25 = vpop.eup %3227 }
 0x626   : > { %v1274_v23 = vpop.xlane.xlu0 %1273  ;;  %v1289_v32 = vmul.f32 %v3228_v25, %v3214_v56  ;;  %v3115_v56 = vld [vmem:[#allocation11] sm:$0xff]  }
 0x627   : > { %v995_v24 = vpack.c.bf16 %v3062_v21, %v3061_v22  ;;  %3235 = vrcp.f32 %v1274_v23 }
 0x629   : > { %v3230_v26 = vpop.eup %3229  ;;  %2809 = vmatpush3.bf16.msra.mxu0 %v995_v24 }
 0x62a   : > { %v3232_v27 = vpop.eup %3231  ;;  %v3055_v28 = vpop.permute.xlu0 %3054  ;;  %2820 = vmatprep.subr.bf16.mxu0 %v3724_v4  ;;  %v1290_v33 = vmul.f32 %v3230_v26, %v3216_v61 }
 0x62b   : > { %v3234_v16 = vpop.eup %3233  ;;  %v3057_v29 = vunpack.i.h.bf16 %v3055_v28  ;;  %v3056_v31 = vunpack.i.l.bf16 %v3055_v28  ;;  %v1288_v36 = vmul.f32 %v3232_v27, %v4307_v49 }
 0x62c   : > { %v1291_v34 = vmul.f32 %v3234_v16, %v3218_v63 }
 0x62d   : > { %v994_v35 = vpack.c.bf16 %v3057_v29, %v3056_v31  ;;  %v1295_v38 = vpack.c.bf16 %v1289_v32, %v1288_v36 }
 0x62e   : > { %v1296_v37 = vpack.c.bf16 %v1291_v34, %v1290_v33  ;;  %v2591_v33 = vld [vmem:[#allocation13] ss:$0 sm:$0xff] }
 0x62f   : > { %2803 = vmatpush3.bf16.msra.mxu1 %v994_v35 }
 0x630   : > { %2811 = vmatmul.mubr.msk.bf16.vlgmr.msra.gmra.mrb[8].mxu0 %vm1205_vm3, %v1296_v37  ;;  %2814 = vmatprep.subr.bf16.mxu1 %v3724_v4 }
 0x631   : > { %2836 = vmatprep.mubr.msk.bf16.mxu0 %vm3726_vm0, %v3724_v4  ;;  %v3236_v44 = vpop.eup %3235  ;;  %2821 = vmatpush3.bf16.msra.mxu0 %v3115_v56 }
 0x632   : > { %2805 = vmatmul.mubr.msk.bf16.vlgmr.msra.gmra.mrb[20].mxu1 %vm1205_vm3, %v1295_v38  ;;  %v1292_v46 = vmul.f32 %v3236_v44, %v4314_v0  ;;  %2822 = vmatprep.subr.bf16.mxu0 %v3724_v4  ;;  %v3243_v38 = vld [vmem:[%s4179_s25] sm:$0xff] }
 0x633   : > { %2816 = vmatprep.mubr.msk.bf16.mxu1 %vm3726_vm0, %v3724_v4  ;;  %v3123_v44 = vld [vmem:[#allocation17] ss:$16 sps:$4 sm:$0xff]  }
 0x635   : > { %2823 = vmatpush3.bf16.msra.mxu0 %v3116_v59 }
 0x636   : > { %2824 = vmatprep.subr.bf16.mxu0 %v3724_v4 }
 0x639   : > { %2825 = vmatpush3.bf16.msra.mxu0 %v3117_v53  ;;  %v3137_v53 = vld [vmem:[#allocation17 + $0x44] ss:$16 sps:$4 sm:$0xff]  }
 0x63a   : > { %2826 = vmatprep.subr.bf16.mxu0 %v3724_v4 }
 0x63d   : > { %2827 = vmatpush3.bf16.msra.mxu0 %v3118_v7  ;;  %v3144_v7 = vld [vmem:[#allocation17 + $0x68] ss:$16 sps:$4 sm:$0xff]  }
 0x63e   : > { %2828 = vmatprep.subr.bf16.mxu0 %v3724_v4 }
 0x641   : > { %2829 = vmatpush3.bf16.msra.mxu0 %v3119_v8  ;;  %v3149_v8 = vld [vmem:[#allocation17 + $0x84] ss:$16 sps:$4 sm:$0xff]  }
 0x642   : > { %2830 = vmatprep.subr.bf16.mxu0 %v3724_v4 }
 0x645   : > { %2831 = vmatpush3.bf16.msra.mxu0 %v3120_v9  ;;  %v3152_v9 = vld [vmem:[#allocation17 + $0x8c] ss:$16 sps:$4 sm:$0xff]  }
 0x646   : > { %2832 = vmatprep.subr.bf16.mxu0 %v3724_v4 }
 0x649   : > { %2833 = vmatpush3.bf16.msra.mxu0 %v3121_v10  ;;  %v3147_v10 = vld [vmem:[#allocation17 + $0x80] ss:$16 sps:$4 sm:$0xff]  }
 0x64a   : > { %2834 = vmatprep.subr.bf16.mxu0 %v3724_v4 }
 0x64d   : > { %2835 = vmatpush3.bf16.msra.mxu0 %v3122_v11  ;;  %v3150_v11 = vld [vmem:[#allocation17 + $0x88] ss:$16 sps:$4 sm:$0xff]  }
 0x655   : > { %v1277_v39 = vpop.xlane.xlu1 %1276 }
 0x656   : > { %3237 = vrcp.f32 %v1277_v39 }
 0x659   : > { %v3065_v40 = vpop.permute.xlu1 %3064 }
 0x65a   : > { %v3067_v41 = vunpack.i.h.bf16 %v3065_v40  ;;  %v3066_v42 = vunpack.i.l.bf16 %v3065_v40 }
 0x65c   : > { %v996_v43 = vpack.c.bf16 %v3067_v41, %v3066_v42  ;;  %v3244_v42 = vld [vmem:[%s4179_s25 + $0x8] sm:$0xff]  ;;  %s4390_s25 = scalar_lea.hbm %s4498_s16, %s2673_s14 }
 0x65e   : > { %2815 = vmatpush3.bf16.msra.mxu1 %v996_v43 }
 0x660   : > { %v3238_v45 = vpop.eup %3237 }
 0x661   : > { %v1293_v47 = vmul.f32 %v3238_v45, %v3226_v13  ;;  %v3125_v45 = vld [vmem:[#allocation17 + $0x4] ss:$16 sps:$4 sm:$0xff]  }
 0x662   : > { %1876 = vmatprep.subr.bf16.mxu1 %v3125_v45  ;;  %v3174_v45 = vld [vmem:[#allocation20 + $0x80] sm:$0xff]  }
 0x663   : > { %v1297_v48 = vpack.c.bf16 %v1293_v47, %v1292_v46  ;;  %v3128_v46 = vld [vmem:[#allocation17 + $0xc] ss:$16 sps:$4 sm:$0xff]   ;;  %v3131_v47 = vld [vmem:[#allocation17 + $0x24] ss:$16 sps:$4 sm:$0xff]  }
 0x664   : > { %1919 = vmatprep.subr.bf16.mxu0 %v3128_v46  ;;  %v3175_v46 = vld [vmem:[#allocation20 + $0x48] sm:$0xff]  }
 0x665   : > { %2817 = vmatmul.mubr.msk.bf16.vlgmr.msra.gmra.mrb[24].mxu1 %vm1205_vm3, %v1297_v48  ;;  %v3134_v48 = vld [vmem:[#allocation17 + $0x2c] ss:$16 sps:$4 sm:$0xff]  }
 0x666   : > { %1908 = vmatprep.mubr.bf16.mxu1 %v3725_v30  ;;  %1877 = vmatpush1.bf16.msra.mxu1 %v3123_v44  ;;  %v3173_v44 = vld [vmem:[#allocation20] sm:$0xff]  }
 0x667   : > { %1878 = vmatprep.subr.bf16.mxu1 %v3131_v47  ;;  %v3176_v47 = vld [vmem:[#allocation20 + $0xc8] sm:$0xff]  }
 0x684   : > { %v1335_v49 = vpop.f32.mrb[4].mxu0 }
 0x685   : > { %v2800_v50 = vpop.f32.mrb[5].mxu0 }
 0x686   : > { %v1338_v51 = vpop.f32.mrb[6].mxu0  ;;  %v3132_v50 = vld [vmem:[#allocation17 + $0x28] ss:$16 sps:$4 sm:$0xff]  }
 0x687   : > { %v2801_v52 = vpop.f32.mrb[7].mxu0 }
 0x703   : > { %v1423_v60 = vpop.f32.mrb[8].mxu0 }
 0x704   : > { %v2812_v61 = vpop.f32.mrb[9].mxu0 }
 0x705   : > { %v1379_v62 = vpop.f32.mrb[20].mxu1  ;;  %v1426_v63 = vpop.f32.mrb[10].mxu0 }
 0x706   : > { %v3073_v0 = vpack.i.bf16 %v1426_v63, %v1423_v60  ;;  %v2806_v1 = vpop.f32.mrb[21].mxu1  ;;  %v2813_v2 = vpop.f32.mrb[11].mxu0 }
 0x707   : > { %v1382_v3 = vpop.f32.mrb[22].mxu1  ;;  %v3135_v1 = vld [vmem:[#allocation17 + $0x40] ss:$16 sps:$4 sm:$0xff]   ;;  %v3138_v2 = vld [vmem:[#allocation17 + $0x48] ss:$16 sps:$4 sm:$0xff]  }
 0x708   : > { %v3068_v5 = vpack.i.bf16 %v1382_v3, %v1379_v62  ;;  %3074 = vrot.lane.b32.xlu0 %v3073_v0, %s3729_s30  ;;  %v2807_v6 = vpop.f32.mrb[23].mxu1  ;;  %v3140_v0 = vld [vmem:[#allocation17 + $0x4c] ss:$16 sps:$4 sm:$0xff]   ;;  %v3143_v3 = vld [vmem:[#allocation17 + $0x64] ss:$16 sps:$4 sm:$0xff]  }
 0x709   : > { %v3141_v6 = vld [vmem:[#allocation17 + $0x60] ss:$16 sps:$4 sm:$0xff]  }
 0x70a   : > { %3069 = vrot.lane.b32.xlu1 %v3068_v5, %s3728_s3  ;;  %v3146_v5 = vld [vmem:[#allocation17 + $0x6c] ss:$16 sps:$4 sm:$0xff]   ;;  %s3615_s3 = sshll.u32 %s3730_s15, 4  ;;  %s3616_s3 = int_to_ptr.vmem [resolvable:$false] %s3615_s3 }
 0x70b   : > { %s3617_s30 = scalar_lea.vmem %s3616_s3, 512  ;;  %p3618_p12 = scmp.lt.s32.totalorder %s4385_s19, %s3616_s3 }
 0x738   : > { %v1467_v12 = vpop.f32.mrb[24].mxu1 }
 0x739   : > { %v2818_v13 = vpop.f32.mrb[25].mxu1 }
 0x73a   : > { %v1470_v14 = vpop.f32.mrb[26].mxu1  ;;  %v3158_v13 = vld [vmem:[#allocation17 + $0xac] ss:$16 sps:$4 sm:$0xff]  }
 0x73b   : > { %v3078_v15 = vpack.i.bf16 %v1470_v14, %v1467_v12  ;;  %v2819_v17 = vpop.f32.mrb[27].mxu1  ;;  %v3155_v12 = vld [vmem:[#allocation17 + $0xa4] ss:$16 sps:$4 sm:$0xff]   ;;  %v3153_v14 = vld [vmem:[#allocation17 + $0xa0] ss:$16 sps:$4 sm:$0xff]  }
 0x73c   : > { %v3159_v17 = vld [vmem:[#allocation17 + $0xc0] ss:$16 sps:$4 sm:$0xff]  }
 0x73d   : > { %3079 = vrot.lane.b32.xlu1 %v3078_v15, %s3727_s1  ;;  %v3156_v15 = vld [vmem:[#allocation17 + $0xa8] ss:$16 sps:$4 sm:$0xff]   ;;  %s3611_s1 = scalar_lea.vmem %s4385_s19, 256 }
 0x73e   : > { %p3612_p2 = scmp.ne.s32.totalorder %s4385_s19, %s3611_s1  ;;  %p3619_p0 = scmp.lt.s32.totalorder %s3617_s30, %s3611_s1 }
 0x740   : > { %p3613_p10 = pnand %p3612_p2, %p4499_p8  ;;  %p3620_p5 = por %p3619_p0, %p3618_p12 }
 0x742   : > { %p3614_p11 = pneg %p3613_p10 }
 0x744   : > { %p3621_p7 = pnand %p3620_p5, %p3614_p11 }
 0x77a   : > { %v3075_v21 = vpop.permute.xlu0 %3074 }
 0x77b   : > { %v3077_v24 = vunpack.i.h.bf16 %v3075_v21  ;;  %v3076_v4 = vunpack.i.l.bf16 %v3075_v21  ;;  %v3167_v21 = vld [vmem:[#allocation17 + $0xe4] ss:$16 sps:$4 sm:$0xff]  }
 0x77c   : > { %v3070_v18 = vpop.permute.xlu1 %3069 }
 0x77d   : > { %v3072_v19 = vunpack.i.h.bf16 %v3070_v18  ;;  %v3071_v20 = vunpack.i.l.bf16 %v3070_v18  ;;  %v3161_v18 = vld [vmem:[#allocation17 + $0xc4] ss:$16 sps:$4 sm:$0xff]  }
 0x77f   : > { %v1499_v22 = vsel %vm997_vm1, %v1338_v51, %v3072_v19  ;;  %v1498_v23 = vsel %vm997_vm1, %v1335_v49, %v3071_v20  ;;  %v3129_v49 = vld [vmem:[#allocation17 + $0x20] ss:$16 sps:$4 sm:$0xff]   ;;  %v3162_v19 = vld [vmem:[#allocation17 + $0xc8] ss:$16 sps:$4 sm:$0xff]   ;;  %v3164_v20 = vld [vmem:[#allocation17 + $0xcc] ss:$16 sps:$4 sm:$0xff]  }
 0x780   : > { %v1501_v28 = vsel %vm1500_vm5, %v1498_v23, %v3076_v4  ;;  %v1502_v16 = vsel %vm1500_vm5, %v1499_v22, %v3077_v24  ;;  %1879 = vmatpush1.bf16.msra.mxu1 %v3129_v49  ;;  %v3170_v22 = vld [vmem:[#allocation17 + $0xec] ss:$16 sps:$4 sm:$0xff]   ;;  %v3165_v23 = vld [vmem:[#allocation17 + $0xe0] ss:$16 sps:$4 sm:$0xff]   ;;  %v3168_v24 = vld [vmem:[#allocation17 + $0xe8] ss:$16 sps:$4 sm:$0xff]  }
 0x781   : > { %1880 = vmatprep.subr.bf16.mxu1 %v3137_v53  ;;  %v3171_v4 = vld [vmem:[#allocation20 + $0x40] sm:$0xff]   ;;  %v3178_v49 = vld [vmem:[#allocation20 + $0x88] sm:$0xff]  }
 0x782   : > { %v3188_v53 = vld [vmem:[#allocation20 + $0xe0] sm:$0xff]  }
 0x784   : > { %1881 = vmatpush1.bf16.msra.mxu1 %v3135_v1  ;;  %v3190_v1 = vld [vmem:[#allocation20 + $0xa0] sm:$0xff]  }
 0x785   : > { %1882 = vmatprep.subr.bf16.mxu1 %v3143_v3  ;;  %v3192_v3 = vld [vmem:[#allocation20 + $0xe8] sm:$0xff]  }
 0x788   : > { %1883 = vmatpush1.bf16.msra.mxu1 %v3141_v6  ;;  %v3194_v6 = vld [vmem:[#allocation20 + $0xa8] sm:$0xff]  }
 0x789   : > { %1884 = vmatprep.subr.bf16.mxu1 %v3149_v8  ;;  %v3196_v8 = vld [vmem:[#allocation20 + $0xf0] sm:$0xff]  }
 0x78c   : > { %1885 = vmatpush1.bf16.msra.mxu1 %v3147_v10  ;;  %v3198_v10 = vld [vmem:[#allocation20 + $0xb0] sm:$0xff]  }
 0x78d   : > { %1886 = vmatprep.subr.bf16.mxu1 %v3155_v12  ;;  %v3200_v12 = vld [vmem:[#allocation20 + $0xf8] sm:$0xff]  }
 0x790   : > { %1887 = vmatpush1.bf16.msra.mxu1 %v3153_v14  ;;  %v3202_v14 = vld [vmem:[#allocation20 + $0xb8] sm:$0xff]  }
 0x791   : > { %1888 = vmatprep.subr.bf16.mxu1 %v3161_v18 }
 0x794   : > { %1889 = vmatpush1.bf16.msra.mxu1 %v3159_v17  ;;  %v1710_v17 = vsub.s32 3, %v4239_v54 }
 0x795   : > { %1890 = vmatprep.subr.bf16.mxu1 %v3167_v21 }
 0x798   : > { %1891 = vmatpush1.bf16.msra.mxu1 %v3165_v23 }
 0x799   : > { %2708 = vmatprep.subr.bf16.mxu1 %v3171_v4 }
 0x7af   : > { %v3080_v25 = vpop.permute.xlu1 %3079 }
 0x7b0   : > { %v3082_v26 = vunpack.i.h.bf16 %v3080_v25  ;;  %v3081_v27 = vunpack.i.l.bf16 %v3080_v25  ;;  %v3172_v25 = vld [vmem:[#allocation20 + $0xc0] sm:$0xff]  }
 0x7b2   : > { %v1505_v29 = vsel %vm1503_vm6, %v1502_v16, %v3082_v26  ;;  %v1504_v31 = vsel %vm1503_vm6, %v1501_v28, %v3081_v27 }
 0x7b3   : > { %v1506_v32 = vpack.c.bf16 %v1505_v29, %v1504_v31 }
 0x7b5   : > { %2837 = vmatmul.mubr.bf16.vlgmr.msra.gmra.mrb[12].mxu0 %v1506_v32 }
 0x7b6   : > { %1951 = vmatprep.mubr.bf16.mxu0 %v3725_v30  ;;  %v3126_v30 = vld [vmem:[#allocation17 + $0x8] ss:$16 sps:$4 sm:$0xff]  }
 0x7b7   : > { %1920 = vmatpush1.bf16.msra.mxu0 %v3126_v30 }
 0x7b8   : > { %1921 = vmatprep.subr.bf16.mxu0 %v3134_v48  ;;  %v3177_v48 = vld [vmem:[#allocation20 + $0x8] sm:$0xff]  }
 0x7bb   : > { %1922 = vmatpush1.bf16.msra.mxu0 %v3132_v50  ;;  %v3179_v50 = vld [vmem:[#allocation20 + $0x50] sm:$0xff]  }
 0x7bc   : > { %1923 = vmatprep.subr.bf16.mxu0 %v3140_v0  ;;  %v3189_v0 = vld [vmem:[#allocation20 + $0x20] sm:$0xff]  }
 0x7bf   : > { %1924 = vmatpush1.bf16.msra.mxu0 %v3138_v2  ;;  %v3191_v2 = vld [vmem:[#allocation20 + $0x68] sm:$0xff]  }
 0x7c0   : > { %1925 = vmatprep.subr.bf16.mxu0 %v3146_v5  ;;  %v3193_v5 = vld [vmem:[#allocation20 + $0x28] sm:$0xff]  }
 0x7c3   : > { %1926 = vmatpush1.bf16.msra.mxu0 %v3144_v7  ;;  %v3195_v7 = vld [vmem:[#allocation20 + $0x70] sm:$0xff]  }
 0x7c4   : > { %1927 = vmatprep.subr.bf16.mxu0 %v3152_v9  ;;  %v3197_v9 = vld [vmem:[#allocation20 + $0x30] sm:$0xff]  }
 0x7c7   : > { %1928 = vmatpush1.bf16.msra.mxu0 %v3150_v11  ;;  %v3199_v11 = vld [vmem:[#allocation20 + $0x78] sm:$0xff]  }
 0x7c8   : > { %1929 = vmatprep.subr.bf16.mxu0 %v3158_v13  ;;  %v3201_v13 = vld [vmem:[#allocation20 + $0x38] sm:$0xff]  }
 0x7cb   : > { %1930 = vmatpush1.bf16.msra.mxu0 %v3156_v15  ;;  %v1694_v15 = vld [vmem:[#allocation19] sm:$0xf] }
 0x7cc   : > { %1931 = vmatprep.subr.bf16.mxu0 %v3164_v20  ;;  %v1699_v18 = vrot.slane %v1694_v15, %v698_v55  ;;  %v1703_v20 = vrot.slane %v1694_v15, %v702_v58  ;;  %v1711_v21 = vrot.slane %v1694_v15, %v1710_v17 }
 0x7cf   : > { %1932 = vmatpush1.bf16.msra.mxu0 %v3162_v19  ;;  %v1707_v19 = vrot.slane %v1694_v15, %v706_v57 }
 0x7d0   : > { %1933 = vmatprep.subr.bf16.mxu0 %v3170_v22 }
 0x7d3   : > { %1934 = vmatpush1.bf16.msra.mxu0 %v3168_v24 }
 0x7d4   : > { %2730 = vmatprep.subr.bf16.mxu0 %v3172_v25 }
 0x888   : > { %v1612_v34 = vpop.f32.mrb[12].mxu0 }
 0x889   : > { %v1613_v35 = vadd.f32 %v2591_v33, %v1612_v34  ;;  %v2838_v36 = vpop.f32.mrb[13].mxu0  ;;  %v2600_v34 = vld [vmem:[#allocation14] ss:$0 sm:$0xff] }
 0x88a   : > { %v1615_v37 = vpop.f32.mrb[14].mxu0 }
 0x88b   : > { %v4355_v39 = vadd.f32 %v3243_v38, %v1613_v35  ;;  %v1616_v40 = vadd.f32 %v2591_v33, %v1615_v37  ;;  %v2839_v41 = vpop.f32.mrb[15].mxu0  ;;  %v2601_v38 = vld [vmem:[#allocation16] ss:$0 sm:$0xff] }
 0x88d   : > { %v4358_v43 = vadd.f32 %v3244_v42, %v1616_v40  ;;  %1623 = vadd.xlane.f32.xlu0 %v4355_v39 }
 0x88f   : > { %1625 = vadd.xlane.f32.xlu1 %v4358_v43 }
 0x91a   : > { %v1624_v51 = vpop.xlane.xlu0 %1623 }
 0x91b   : > { %v1627_v52 = vmul.f32 0.0078125, %v1624_v51  ;;  %v3180_v51 = vld [vmem:[#allocation20 + $0xd0] sm:$0xff]  }
 0x91c   : > { %v1626_v56 = vpop.xlane.xlu1 %1625 }
 0x91d   : > { %v4363_v59 = vsub.f32 %v4355_v39, %v1627_v52  ;;  %v1628_v60 = vmul.f32 0.0078125, %v1626_v56  ;;  %v3181_v52 = vld [vmem:[#allocation20 + $0x10] sm:$0xff]  }
 0x91e   : > { %v3182_v56 = vld [vmem:[#allocation20 + $0x90] sm:$0xff]  }
 0x91f   : > { %v4366_v61 = vsub.f32 %v4358_v43, %v1628_v60  ;;  %v1631_v62 = vmul.f32 %v4363_v59, %v4363_v59  ;;  %v3184_v60 = vld [vmem:[#allocation20 + $0xd8] sm:$0xff]  }
 0x921   : > { %1633 = vadd.xlane.f32.xlu0 %v1631_v62  ;;  %v1632_v63 = vmul.f32 %v4366_v61, %v4366_v61  ;;  %v3186_v62 = vld [vmem:[#allocation20 + $0x98] sm:$0xff]  }
 0x925   : > { %1635 = vadd.xlane.f32.xlu0 %v1632_v63  ;;  %v3187_v63 = vld [vmem:[#allocation20 + $0x60] sm:$0xff]  }
 0x9ae   : > { %v1634_v26 = vpop.xlane.xlu0 %1633 }
 0x9af   : > { %v1637_v27 = vmul.f32 0.0078125, %v1634_v26 }
 0x9b1   : > { %v1639_v28 = vadd.f32 1e-05, %v1637_v27 }
 0x9b2   : > { %v1636_v16 = vpop.xlane.xlu0 %1635 }
 0x9b3   : > { %3239 = vrsqrt.f32 %v1639_v28  ;;  %v1638_v29 = vmul.f32 0.0078125, %v1636_v16 }
 0x9b5   : > { %v1640_v31 = vadd.f32 1e-05, %v1638_v29 }
 0x9b7   : > { %3241 = vrsqrt.f32 %v1640_v31 }
 0x9bd   : > { %v3240_v32 = vpop.eup %3239 }
 0x9be   : > { %v1643_v33 = vmul.f32 %v3240_v32, %v4363_v59  ;;  %v3183_v59 = vld [vmem:[#allocation20 + $0x58] sm:$0xff]  }
 0x9c0   : > { %v1651_v37 = vmul.f32 %v2600_v34, %v1643_v33 }
 0x9c1   : > { %v3242_v35 = vpop.eup %3241 }
 0x9c2   : > { %v1644_v36 = vmul.f32 %v3242_v35, %v4366_v61  ;;  %v1659_v41 = vadd.f32 %v2601_v38, %v1651_v37  ;;  %v3185_v61 = vld [vmem:[#allocation20 + $0x18] sm:$0xff]  }
 0x9c4   : > { %v1652_v40 = vmul.f32 %v2600_v34, %v1644_v36 }
 0x9c6   : > { %v1660_v42 = vadd.f32 %v2601_v38, %v1652_v40 }
 0x9c8   : > { %v1661_v30 = vpack.c.bf16 %v1660_v42, %v1659_v41 }
 0x9ca   : > { %1909 = vmatmul.mubr.bf16.vlgmr.msra.gmra.mrb[28].mxu1 %v1661_v30  ;;  %1952 = vmatmul.mubr.bf16.vlgmr.msra.gmra.mrb[16].mxu0 %v1661_v30 }
 0x9cb   : > { %2709 = vmatpush3.bf16.msra.mxu1 %v3173_v44  ;;  %2731 = vmatpush3.bf16.msra.mxu0 %v3174_v45 }
 0x9cc   : > { %2710 = vmatprep.subr.bf16.mxu1 %v3175_v46  ;;  %2732 = vmatprep.subr.bf16.mxu0 %v3176_v47 }
 0x9cf   : > { %2711 = vmatpush3.bf16.msra.mxu1 %v3177_v48  ;;  %2733 = vmatpush3.bf16.msra.mxu0 %v3178_v49  ;;  %v2634_v48 = vld [vmem:[#allocation22] ss:$0 sm:$0xff] }
 0x9d0   : > { %2712 = vmatprep.subr.bf16.mxu1 %v3179_v50  ;;  %2734 = vmatprep.subr.bf16.mxu0 %v3180_v51 }
 0x9d3   : > { %2713 = vmatpush3.bf16.msra.mxu1 %v3181_v52  ;;  %2735 = vmatpush3.bf16.msra.mxu0 %v3182_v56 }
 0x9d4   : > { %2714 = vmatprep.subr.bf16.mxu1 %v3183_v59  ;;  %2736 = vmatprep.subr.bf16.mxu0 %v3184_v60 }
 0x9d7   : > { %2715 = vmatpush3.bf16.msra.mxu1 %v3185_v61  ;;  %2737 = vmatpush3.bf16.msra.mxu0 %v3186_v62 }
 0x9d8   : > { %2716 = vmatprep.subr.bf16.mxu1 %v3187_v63  ;;  %2738 = vmatprep.subr.bf16.mxu0 %v3188_v53 }
 0x9db   : > { %2717 = vmatpush3.bf16.msra.mxu1 %v3189_v0  ;;  %2739 = vmatpush3.bf16.msra.mxu0 %v3190_v1 }
 0x9dc   : > { %2718 = vmatprep.subr.bf16.mxu1 %v3191_v2  ;;  %2740 = vmatprep.subr.bf16.mxu0 %v3192_v3 }
 0x9df   : > { %2719 = vmatpush3.bf16.msra.mxu1 %v3193_v5  ;;  %2741 = vmatpush3.bf16.msra.mxu0 %v3194_v6 }
 0x9e0   : > { %2720 = vmatprep.subr.bf16.mxu1 %v3195_v7  ;;  %2742 = vmatprep.subr.bf16.mxu0 %v3196_v8 }
 0x9e3   : > { %2721 = vmatpush3.bf16.msra.mxu1 %v3197_v9  ;;  %2743 = vmatpush3.bf16.msra.mxu0 %v3198_v10 }
 0x9e4   : > { %2722 = vmatprep.subr.bf16.mxu1 %v3199_v11  ;;  %2744 = vmatprep.subr.bf16.mxu0 %v3200_v12 }
 0x9e7   : > { %2723 = vmatpush3.bf16.msra.mxu1 %v3201_v13  ;;  %2745 = vmatpush3.bf16.msra.mxu0 %v3202_v14 }
 0xa9d   : > { %v1910_v22 = vpop.f32.mrb[28].mxu1  ;;  %v1953_v23 = vpop.f32.mrb[16].mxu0 }
 0xa9e   : > { %v1911_v24 = vadd.f32 %v1910_v22, %v1699_v18  ;;  %v1954_v4 = vadd.f32 %v1953_v23, %v1707_v19  ;;  %v1912_v25 = vpop.f32.mrb[29].mxu1  ;;  %v1955_v26 = vpop.f32.mrb[17].mxu0 }
 0xa9f   : > { %v1913_v27 = vadd.f32 %v1912_v25, %v1703_v20  ;;  %v1956_v28 = vadd.f32 %v1955_v26, %v1711_v21  ;;  %v1914_v16 = vpop.f32.mrb[30].mxu1  ;;  %v1957_v29 = vpop.f32.mrb[18].mxu0 }
 0xaa0   : > { %v1915_v31 = vadd.f32 %v1914_v16, %v1699_v18  ;;  %v1958_v32 = vadd.f32 %v1957_v29, %v1707_v19  ;;  %v1916_v55 = vpop.f32.mrb[31].mxu1  ;;  %v1959_v33 = vpop.f32.mrb[19].mxu0  ;;  %v1962_v35 = vmax.f32 %v1911_v24, 0.0  ;;  %v1964_v54 = vmax.f32 %v1954_v4, 0.0 }
 0xaa1   : > { %v1917_v34 = vadd.f32 %v1916_v55, %v1703_v20  ;;  %v1960_v57 = vadd.f32 %v1959_v33, %v1711_v21  ;;  %v1963_v37 = vmax.f32 %v1913_v27, 0.0  ;;  %v1965_v38 = vmax.f32 %v1956_v28, 0.0 }
 0xaa2   : > { %v1966_v58 = vmax.f32 %v1915_v31, 0.0  ;;  %v1968_v36 = vmax.f32 %v1958_v32, 0.0 }
 0xaa3   : > { %v1967_v40 = vmax.f32 %v1917_v34, 0.0  ;;  %v1969_v41 = vmax.f32 %v1960_v57, 0.0 }
 0xaa4   : > { %v1970_v42 = vpack.c.bf16 %v1966_v58, %v1962_v35  ;;  %v1972_v44 = vpack.c.bf16 %v1968_v36, %v1964_v54 }
 0xaa5   : > { %v1971_v45 = vpack.c.bf16 %v1967_v40, %v1963_v37  ;;  %v1973_v30 = vpack.c.bf16 %v1969_v41, %v1965_v38 }
 0xaa7   : > { %2269 = vmatprep.mubr.bf16.mxu1 %v1971_v45  ;;  %2310 = vmatprep.mubr.bf16.mxu0 %v1973_v30 }
 0xaa8   : > { %2270 = vmatmul.mubr.bf16.vlgmr.msra.gmra.mrb[32].mxu1 %v1970_v42  ;;  %2311 = vmatmul.mubr.bf16.vlgmr.msra.gmra.mrb[20].mxu0 %v1972_v44 }
 0xb7b   : > { %v2724_v46 = vpop.f32.mrb[32].mxu1  ;;  %v2746_v47 = vpop.f32.mrb[20].mxu0 }
 0xb7c   : > { %v2725_v49 = vpop.f32.mrb[33].mxu1  ;;  %v2747_v50 = vpop.f32.mrb[21].mxu0 }
 0xb7d   : > { %v2726_v51 = vadd.f32 %v2725_v49, %v2724_v46  ;;  %v2748_v52 = vadd.f32 %v2747_v50, %v2746_v47  ;;  %v2727_v56 = vpop.f32.mrb[34].mxu1  ;;  %v2749_v59 = vpop.f32.mrb[22].mxu0 }
 0xb7e   : > { %v2728_v60 = vpop.f32.mrb[35].mxu1  ;;  %v2750_v61 = vpop.f32.mrb[23].mxu0 }
 0xb7f   : > { %v2272_v62 = vadd.f32 %v2726_v51, %v2634_v48  ;;  %v2729_v63 = vadd.f32 %v2728_v60, %v2727_v56  ;;  %v2751_v53 = vadd.f32 %v2750_v61, %v2749_v59 }
 0xb81   : > { %v2313_v0 = vadd.f32 %v2748_v52, %v2272_v62  ;;  %v2275_v1 = vadd.f32 %v2729_v63, %v2634_v48 }
 0xb83   : > { %v2319_v2 = vadd.f32 %v2313_v0, %v4355_v39  ;;  %v2316_v3 = vadd.f32 %v2751_v53, %v2275_v1 }
 0xb85   : > { %2321 = vst [vmem:[%s616_s13] sm:$0xff] %v2319_v2  ;;  %v2320_v5 = vadd.f32 %v2316_v3, %v4358_v43 }
 0xb87   : > { %2322 = vst [vmem:[%s616_s13 + $0x8] sm:$0xff] %v2320_v5 }
 0xb88   : > { %3624 = shalt.err (!%p3621_p7)
}
 0xb89   : > { %s3625_s13 = scalar_lea.hbm %s4390_s25, 256  ;;  %s3629_s17 = scalar_lea.hbm %s4498_s16, 512 }
 0xb8a   : > { %p3626_p6 = scmp.ne.s32.totalorder %s4390_s25, %s3625_s13  ;;  %p3630_p13 = scmp.lt.u32.totalorder %s4390_s25, %s4498_s16 }
 0xb8b   : > { %p3631_p1 = scmp.lt.u32.totalorder %s3629_s17, %s3625_s13  ;;  %p3633_p2 = scmp.lt.u32.totalorder %s3625_s13, %s4390_s25 }
 0xb8c   : > { %p3627_p9 = pnand %p3626_p6, %p4499_p8 }
 0xb8d   : > { %p3632_p3 = por %p3631_p1, %p3630_p13 }
 0xb8e   : > { %p3628_p4 = pneg %p3627_p9 }
 0xb8f   : > { %p3634_p10 = por %p3633_p2, %p3632_p3 }
 0xb91   : > { %p3635_p11 = pnand %p3634_p10, %p3628_p4 }
 0xb93   : > { %3638 = shalt.err (!%p3635_p11)
}
 0xb94   : > { %s3731_s1 = smov 128   ;;  %s3732_s30 = smov 8  }
 0xb95   : > { %2890 = dma.vmem_to_hbm [thread:$0]  (%p4499_p8), %s4385_s19, 256, %s4390_s25, %s2324_s21, %s3731_s1, %s3731_s1, %s3732_s30  }
 0xb96 PF: > { %s4500_s14 = sld [smem:[#allocation32_spill]]  ;;  %p4501_p12 = scmp.ne.s32.totalorder %s4480_s23, 0 }
 0xb97   : > { %p4502_p0 = scmp.ge.s32.totalorder %s3701_s28, 2 }
 0xb99   : > { %p2934_p5 = pnand %p4502_p0, %p4501_p12 }
 0xb9c   : > { %s2352_s20 = sand.u32 1, %s4500_s14  }
 0xb9d   : > { %s2353_s13 = scalar_lea.sflag [#allocation4], %s2352_s20 }
 0xb9e   : > { %3684 = dma.done.wait (!%p2934_p5), %s2353_s13, 256  }
 0xb9f   : > { %3686 = vsyncadd (!%p2934_p5), %s2353_s13, 4294967040  ;;  %p32_p7 = scmp.ge.s32.totalorder %s4094_s18, 4   ;;  %s4503_s25 = smov %s3693_s26 }
 0xba0   : > { %s4504_s26 = smov %s3697_s27  ;;  %s4505_s27 = smov %s4105_s29 }
 0xba1   : > { %s4506_s28 = smov %s4094_s18  ;;  %34 = sbr.rel (!%p32_p7) target bundleno = 16 (0x10), region = 165 }
 0xba8   :  { %2358 = vsyncpa [#allocation3], 1 }
 0xba9   :  { %2360 = vsyncpa [#allocation3 + $0x1], 1 }
 0xbaa   :  { %2361 = vsyncpa [#allocation6], 1 }
 0xbab   :  { %2362 = vsyncpa [#allocation9], 1 }
 0xbac   :  { %2363 = vsyncpa [#allocation12], 1 }
 0xbad   :  { %2364 = vsyncpa [#allocation15], 1 }
 0xbae   :  { %2365 = vsyncpa [#allocation18], 1 }
 0xbaf   :  { %2366 = vsyncpa [#allocation21], 1 }
 0xbb0   :  { %2367 = vsyncpa [#allocation4], 1 }
 0xbb1   :  { %2369 = vsyncpa [#allocation4 + $0x1], 1 }

</bundles_post_ra>
